<compile_context>
chip_gen: v5e
topology: v5e:2x2
jax: 0.10.0
libtpu: 0.0.40
codegen_flags: <defaults>
</compile_context>

<pallas_src>
import functools
import math

import jax
import jax.numpy as jnp
from jax.experimental import pallas as pl
from jax.experimental.pallas import tpu as pltpu

# ----------------------------- config (small) -----------------------------
VOCAB = 100
MAX_POS = 32
HIDDEN = 32
NUM_HEADS = 4
HEAD_DIM = HIDDEN // NUM_HEADS
FFN = 64
NUM_LAYERS = 2
NUM_LABELS = 2
LN_EPS = 1e-12

# packed-slab layout constants
GLOB_ROWS = 8 + HIDDEN          # rows 0..2: emb_ln_g, emb_ln_b, cls_b ; rows 8..8+H: cls_w
WMAT_COLS = 3 * HIDDEN + HIDDEN + FFN   # [w_qkv | wo | wi] along lanes


# --------------------------- in-kernel helpers -----------------------------


def _layernorm(x, gamma, beta, eps=LN_EPS):
    mean = jnp.mean(x, axis=-1, keepdims=True)
    var = jnp.mean((x - mean) ** 2, axis=-1, keepdims=True)
    return (x - mean) * jax.lax.rsqrt(var + eps) * gamma + beta


def _gelu(x):
    # tanh-approx GELU (BERT intermediate activation); fp32 elementwise math.
    return 0.5 * x * (1.0 + jnp.tanh(0.7978845608028654 * (x + 0.044715 * x * x * x)))


# ------------------------------ fused kernel -------------------------------


def _bert_fused_kernel(
    emb_ref,      # (M, H)  embedding sum (pre-LayerNorm)
    mask_ref,     # (B, S)  attention mask (1 = keep)
    glob_ref,     # (GLOB_ROWS, 128) packed globals: emb LN + classifier
    wmat_ref,     # (L, H, WMAT_COLS) packed [w_qkv | wo | wi]
    wf_ref,       # (L, F, H)
    lvec_ref,     # (L, 8, 128) packed per-layer bias/LN rows
    logits_ref,   # (B, NUM_LABELS)
    *, batch, seq,
):
    B, S = batch, seq
    H, NH, DH, F = HIDDEN, NUM_HEADS, HEAD_DIM, FFN
    M = B * S
    scale = 1.0 / math.sqrt(DH)

    glob = glob_ref[...]
    emb_ln_g = glob[0:1, :H]
    emb_ln_b = glob[1:2, :H]
    cls_b = glob[2:3, :NUM_LABELS]
    cls_w = glob[8:8 + H, :NUM_LABELS]

    # Embedding LayerNorm (no dummy zero residual).
    x = _layernorm(emb_ref[...].astype(jnp.float32), emb_ln_g, emb_ln_b)

    # Additive attention-mask bias, built ONCE (hoisted broadcast), shared by
    # every layer and head.  (B, 1, S)
    mask_bias = ((1.0 - mask_ref[...].astype(jnp.float32)) * (-1e9))[:, None, :]

    for l in range(NUM_LAYERS):          # static unroll, all weights in VMEM
        # ---- per-layer weights / params hoisted into locals ----
        wmat = wmat_ref[l]                          # (H, 3H + H + F)
        w_qkv = wmat[:, 0:3 * H]
        wo = wmat[:, 3 * H:4 * H]
        wi = wmat[:, 4 * H:4 * H + F]
        wf = wf_ref[l]                              # (F, H)

        vec = lvec_ref[l]                           # (8, 128)
        b_qkv = vec[0:1, :3 * H]
        bo = vec[1:2, :H]
        ln1_g = vec[2:3, :H]
        ln1_b = vec[3:4, :H]
        bi = vec[4:5, :F]
        bf = vec[5:6, :H]
        ln2_g = vec[6:7, :H]
        ln2_b = vec[7:8, :H]

        # ---- fused QKV projection: one lane-dense (M, 3H) MXU pass ----
        qkv = jnp.dot(x, w_qkv, preferred_element_type=jnp.float32) + b_qkv

        # ---- attention: heads statically unrolled (rank-3 einsums), merged
        #      once via a lane concat before a single Wo matmul ----
        ctx_heads = []
        for h in range(NH):
            q = qkv[:, h * DH:(h + 1) * DH].reshape(B, S, DH)
            k = qkv[:, H + h * DH:H + (h + 1) * DH].reshape(B, S, DH)
            v = qkv[:, 2 * H + h * DH:2 * H + (h + 1) * DH].reshape(B, S, DH)

            s = jnp.einsum("bqd,bkd->bqk", q, k,
                           preferred_element_type=jnp.float32) * scale
            s = s + mask_bias
            s = s - jnp.max(s, axis=-1, keepdims=True)
            p = jnp.exp(s)
            p = p * pl.reciprocal(jnp.sum(p, axis=-1, keepdims=True), approx=True)
            ctx_heads.append(
                jnp.einsum("bqk,bkd->bqd", p, v,
                           preferred_element_type=jnp.float32))        # (B, S, DH)

        # (B, S, NH*DH) with h-major lanes matches the Wo input-feature layout.
        ctx = jnp.concatenate(ctx_heads, axis=-1).reshape(M, H)
        attn = jnp.dot(ctx, wo, preferred_element_type=jnp.float32) + bo

        # residual + LN1 (fused)
        x = _layernorm(attn + x, ln1_g, ln1_b)

        # ---- feed forward ----
        inter = _gelu(jnp.dot(x, wi, preferred_element_type=jnp.float32) + bi)
        ffn = jnp.dot(inter, wf, preferred_element_type=jnp.float32) + bf

        # residual + LN2 (fused)
        x = _layernorm(ffn + x, ln2_g, ln2_b)

    # CLS extraction: static strided read of the first row of each sequence
    # (replaces the one-hot (B, B*S) selector matmul / extra operand).
    cls = x.reshape(B, S, H)[:, 0:1, :].reshape(B, H)
    logits = jnp.dot(cls, cls_w, preferred_element_type=jnp.float32) + cls_b
    logits_ref[...] = logits.astype(logits_ref.dtype)


# --------------------------- parameter creation ---------------------------


def init_params(key):
    def nrm(k, shape, scale=0.02):
        return scale * jax.random.normal(k, shape, dtype=jnp.float32)

    ks = iter(jax.random.split(key, 8))
    L, H, F = NUM_LAYERS, HIDDEN, FFN
    return {
        "word_emb": nrm(next(ks), (VOCAB, H)),
        "pos_emb": nrm(next(ks), (MAX_POS, H)),
        "type_emb": nrm(next(ks), (2, H)),
        "emb_ln_g": jnp.ones((1, H), jnp.float32),
        "emb_ln_b": jnp.zeros((1, H), jnp.float32),
        "w_qkv": nrm(next(ks), (L, H, 3 * H)),
        "b_qkv": jnp.zeros((L, 1, 3 * H), jnp.float32),
        "wo": nrm(next(ks), (L, H, H)),
        "bo": jnp.zeros((L, 1, H), jnp.float32),
        "ln1_g": jnp.ones((L, 1, H), jnp.float32),
        "ln1_b": jnp.zeros((L, 1, H), jnp.float32),
        "wi": nrm(next(ks), (L, H, F)),
        "bi": jnp.zeros((L, 1, F), jnp.float32),
        "wf": nrm(next(ks), (L, F, H)),
        "bf": jnp.zeros((L, 1, H), jnp.float32),
        "ln2_g": jnp.ones((L, 1, H), jnp.float32),
        "ln2_b": jnp.zeros((L, 1, H), jnp.float32),
        "cls_w": nrm(next(ks), (H, NUM_LABELS)),
        "cls_b": jnp.zeros((1, NUM_LABELS), jnp.float32),
    }


def pack_params(params):
    """One-time packing of the many small parameter arrays into a few slabs
    (6 kernel operands total -> 6 DMA descriptors instead of 19)."""
    H, F, L = HIDDEN, FFN, NUM_LAYERS

    glob = jnp.zeros((GLOB_ROWS, 128), jnp.float32)
    glob = glob.at[0, :H].set(params["emb_ln_g"][0])
    glob = glob.at[1, :H].set(params["emb_ln_b"][0])
    glob = glob.at[2, :NUM_LABELS].set(params["cls_b"][0])
    glob = glob.at[8:8 + H, :NUM_LABELS].set(params["cls_w"])

    lvec = jnp.zeros((L, 8, 128), jnp.float32)
    lvec = lvec.at[:, 0, :3 * H].set(params["b_qkv"][:, 0, :])
    lvec = lvec.at[:, 1, :H].set(params["bo"][:, 0, :])
    lvec = lvec.at[:, 2, :H].set(params["ln1_g"][:, 0, :])
    lvec = lvec.at[:, 3, :H].set(params["ln1_b"][:, 0, :])
    lvec = lvec.at[:, 4, :F].set(params["bi"][:, 0, :])
    lvec = lvec.at[:, 5, :H].set(params["bf"][:, 0, :])
    lvec = lvec.at[:, 6, :H].set(params["ln2_g"][:, 0, :])
    lvec = lvec.at[:, 7, :H].set(params["ln2_b"][:, 0, :])

    wmat = jnp.concatenate([params["w_qkv"], params["wo"], params["wi"]],
                           axis=-1)                        # (L, H, 3H+H+F)

    return {
        "word_emb": params["word_emb"],
        "pos_emb": params["pos_emb"],
        "type_emb": params["type_emb"],
        "glob": glob,
        "wmat": wmat,
        "wf": params["wf"],
        "lvec": lvec,
    }


# ------------------------------ forward pass -------------------------------


def _full_block(shape):
    # Whole-array block at grid=(1,): full-extent dims satisfy the (8,128) rule.
    return pl.BlockSpec(shape, lambda *_: (0,) * len(shape))


def bert_classifier_forward(packed, input_ids, attention_mask):
    B, S = input_ids.shape
    H = HIDDEN
    M = B * S

    # Embedding gathers stay in plain JAX (glue); everything downstream of the
    # embedding sum runs inside ONE fused Pallas kernel.
    emb = (
        packed["word_emb"][input_ids]
        + packed["pos_emb"][jnp.arange(S)][None, :, :]
        + packed["type_emb"][0][None, None, :]
    ).reshape(M, H).astype(jnp.float32)

    mask_f = attention_mask.astype(jnp.float32)                       # (B, S)

    operands = (emb, mask_f, packed["glob"], packed["wmat"],
                packed["wf"], packed["lvec"])

    logits = pl.pallas_call(
        functools.partial(_bert_fused_kernel, batch=B, seq=S),
        grid=(1,),
        in_specs=[_full_block(a.shape) for a in operands],
        out_specs=_full_block((B, NUM_LABELS)),
        out_shape=jax.ShapeDtypeStruct((B, NUM_LABELS), jnp.float32),
        compiler_params=pltpu.CompilerParams(
            dimension_semantics=("arbitrary",)),
    )(*operands)
    return logits


# --------------------------- pure-JAX reference -----------------------------


def bert_classifier_reference(params, input_ids, attention_mask):
    B, S = input_ids.shape
    H, NH, DH = HIDDEN, NUM_HEADS, HEAD_DIM
    M = B * S

    def ln(x, g, b):
        mean = jnp.mean(x, -1, keepdims=True)
        var = jnp.mean((x - mean) ** 2, -1, keepdims=True)
        return (x - mean) * jax.lax.rsqrt(var + LN_EPS) * g + b

    emb = (
        params["word_emb"][input_ids]
        + params["pos_emb"][jnp.arange(S)][None, :, :]
        + params["type_emb"][0][None, None, :]
    ).reshape(M, H)
    x = ln(emb, params["emb_ln_g"], params["emb_ln_b"])

    bias = (1.0 - attention_mask.astype(jnp.float32)) * (-1e9)        # (B, S)
    scale = 1.0 / math.sqrt(DH)

    for l in range(NUM_LAYERS):
        qkv = x @ params["w_qkv"][l] + params["b_qkv"][l]
        q, k, v = jnp.split(qkv, 3, axis=-1)

        def heads(t):
            return t.reshape(B, S, NH, DH).transpose(0, 2, 1, 3)

        q, k, v = heads(q), heads(k), heads(v)
        s = jnp.einsum("bhqd,bhkd->bhqk", q, k) * scale
        s = s + bias[:, None, None, :]
        p = jax.nn.softmax(s, axis=-1)
        ctx = jnp.einsum("bhqk,bhkd->bhqd", p, v)
        ctx = ctx.transpose(0, 2, 1, 3).reshape(M, H)
        attn = ctx @ params["wo"][l] + params["bo"][l]
        x = ln(attn + x, params["ln1_g"][l], params["ln1_b"][l])

        inter = x @ params["wi"][l] + params["bi"][l]
        inter = 0.5 * inter * (1.0 + jnp.tanh(
            0.7978845608028654 * (inter + 0.044715 * inter ** 3)))
        ffn = inter @ params["wf"][l] + params["bf"][l]
        x = ln(ffn + x, params["ln2_g"][l], params["ln2_b"][l])

    cls = x.reshape(B, S, H)[:, 0, :]
    return cls @ params["cls_w"] + params["cls_b"]


# ---------------------------------- main -----------------------------------

if __name__ == "__main__":
    key = jax.random.PRNGKey(0)
    pkey, ikey = jax.random.split(key)
    params = init_params(pkey)
    packed = pack_params(params)

    B, S = 2, 8
    input_ids = jax.random.randint(ikey, (B, S), 0, VOCAB, dtype=jnp.int32)
    attention_mask = jnp.array(
        [[1, 1, 1, 1, 1, 1, 1, 1],
         [1, 1, 1, 1, 1, 0, 0, 0]], dtype=jnp.int32
    )

    logits = jax.jit(bert_classifier_forward)(packed, input_ids, attention_mask)
    logits = jax.block_until_ready(logits)

    assert logits.shape == (B, NUM_LABELS)
    assert bool(jnp.all(jnp.isfinite(logits)))

    ref = bert_classifier_reference(params, input_ids, attention_mask)
    assert bool(jnp.allclose(logits, ref, atol=5e-3, rtol=1e-2)), (logits, ref)

    print("KERNEL_OK")
</pallas_src>

<mosaic_0001>
module attributes {stable_mosaic.version = 11 : i64} {
  func.func @_bert_fused_kernel(%arg0: i32, %arg1: memref<16x32xf32, #tpu.memory_space<vmem>>, %arg2: memref<2x8xf32, #tpu.memory_space<vmem>>, %arg3: memref<40x128xf32, #tpu.memory_space<vmem>>, %arg4: memref<2x32x192xf32, #tpu.memory_space<vmem>>, %arg5: memref<2x64x32xf32, #tpu.memory_space<vmem>>, %arg6: memref<2x8x128xf32, #tpu.memory_space<vmem>>, %arg7: memref<2x2xf32, #tpu.memory_space<vmem>>) attributes {dimension_semantics = [#tpu.dimension_semantics<arbitrary>], iteration_bounds = array<i64: 1>, scalar_prefetch = 0 : i64, scratch_operands = 0 : i64, tpu.core_type = #tpu.core_type<tc>, window_params = [{pipeline_mode = #tpu.pipeline_mode<synchronous>, transform_indices = @transform_0, window_bounds = array<i64: 16, 32>}, {pipeline_mode = #tpu.pipeline_mode<synchronous>, transform_indices = @transform_1, window_bounds = array<i64: 2, 8>}, {pipeline_mode = #tpu.pipeline_mode<synchronous>, transform_indices = @transform_2, window_bounds = array<i64: 40, 128>}, {pipeline_mode = #tpu.pipeline_mode<synchronous>, transform_indices = @transform_3, window_bounds = array<i64: 2, 32, 192>}, {pipeline_mode = #tpu.pipeline_mode<synchronous>, transform_indices = @transform_4, window_bounds = array<i64: 2, 64, 32>}, {pipeline_mode = #tpu.pipeline_mode<synchronous>, transform_indices = @transform_5, window_bounds = array<i64: 2, 8, 128>}, {pipeline_mode = #tpu.pipeline_mode<synchronous>, transform_indices = @transform_6, window_bounds = array<i64: 2, 2>}]} {
    %c0 = arith.constant 0 : index
    %c0_0 = arith.constant 0 : index
    %0 = vector.load %arg3[%c0, %c0_0] : memref<40x128xf32, #tpu.memory_space<vmem>>, vector<40x128xf32>
    %1 = vector.extract_strided_slice %0 {offsets = [0, 0], sizes = [1, 32], strides = [1, 1]} : vector<40x128xf32> to vector<1x32xf32>
    %2 = vector.extract_strided_slice %0 {offsets = [1, 0], sizes = [1, 32], strides = [1, 1]} : vector<40x128xf32> to vector<1x32xf32>
    %3 = vector.extract_strided_slice %0 {offsets = [2, 0], sizes = [1, 2], strides = [1, 1]} : vector<40x128xf32> to vector<1x2xf32>
    %4 = vector.extract_strided_slice %0 {offsets = [8, 0], sizes = [32, 2], strides = [1, 1]} : vector<40x128xf32> to vector<32x2xf32>
    %c0_1 = arith.constant 0 : index
    %c0_2 = arith.constant 0 : index
    %5 = vector.load %arg1[%c0_1, %c0_2] : memref<16x32xf32, #tpu.memory_space<vmem>>, vector<16x32xf32>
    %cst = arith.constant dense<0.000000e+00> : vector<16xf32>
    %6 = vector.multi_reduction <add>, %5, %cst [1] : vector<16x32xf32> to vector<16xf32>
    %7 = vector.shape_cast %6 : vector<16xf32> to vector<16x1xf32>
    %cst_3 = arith.constant 3.200000e+01 : f32
    %8 = vector.broadcast %cst_3 : f32 to vector<16x1xf32>
    %9 = arith.divf %7, %8 : vector<16x1xf32>
    %10 = vector.broadcast %9 : vector<16x1xf32> to vector<16x32xf32>
    %11 = arith.subf %5, %10 : vector<16x32xf32>
    %12 = arith.mulf %11, %11 : vector<16x32xf32>
    %cst_4 = arith.constant dense<0.000000e+00> : vector<16xf32>
    %13 = vector.multi_reduction <add>, %12, %cst_4 [1] : vector<16x32xf32> to vector<16xf32>
    %14 = vector.shape_cast %13 : vector<16xf32> to vector<16x1xf32>
    %cst_5 = arith.constant 3.200000e+01 : f32
    %15 = vector.broadcast %cst_5 : f32 to vector<16x1xf32>
    %16 = arith.divf %14, %15 : vector<16x1xf32>
    %17 = vector.broadcast %9 : vector<16x1xf32> to vector<16x32xf32>
    %18 = arith.subf %5, %17 : vector<16x32xf32>
    %cst_6 = arith.constant 9.99999996E-13 : f32
    %19 = vector.broadcast %cst_6 : f32 to vector<16x1xf32>
    %20 = arith.addf %16, %19 : vector<16x1xf32>
    %21 = math.rsqrt %20 : vector<16x1xf32>
    %22 = vector.broadcast %21 : vector<16x1xf32> to vector<16x32xf32>
    %23 = arith.mulf %18, %22 : vector<16x32xf32>
    %24 = vector.broadcast %1 : vector<1x32xf32> to vector<16x32xf32>
    %25 = arith.mulf %23, %24 : vector<16x32xf32>
    %26 = vector.broadcast %2 : vector<1x32xf32> to vector<16x32xf32>
    %27 = arith.addf %25, %26 : vector<16x32xf32>
    %c0_7 = arith.constant 0 : index
    %c0_8 = arith.constant 0 : index
    %28 = vector.load %arg2[%c0_7, %c0_8] : memref<2x8xf32, #tpu.memory_space<vmem>>, vector<2x8xf32>
    %cst_9 = arith.constant 1.000000e+00 : f32
    %29 = vector.broadcast %cst_9 : f32 to vector<2x8xf32>
    %30 = arith.subf %29, %28 : vector<2x8xf32>
    %cst_10 = arith.constant -1.000000e+09 : f32
    %31 = vector.broadcast %cst_10 : f32 to vector<2x8xf32>
    %32 = arith.mulf %30, %31 : vector<2x8xf32>
    %33 = vector.shape_cast %32 : vector<2x8xf32> to vector<2x1x8xf32>
    %c0_11 = arith.constant 0 : index
    %c0_12 = arith.constant 0 : index
    %c0_13 = arith.constant 0 : index
    %34 = vector.load %arg4[%c0_11, %c0_12, %c0_13] : memref<2x32x192xf32, #tpu.memory_space<vmem>>, vector<1x32x192xf32>
    %35 = vector.shape_cast %34 : vector<1x32x192xf32> to vector<32x192xf32>
    %36 = vector.extract_strided_slice %35 {offsets = [0, 0], sizes = [32, 96], strides = [1, 1]} : vector<32x192xf32> to vector<32x96xf32>
    %37 = vector.extract_strided_slice %35 {offsets = [0, 96], sizes = [32, 32], strides = [1, 1]} : vector<32x192xf32> to vector<32x32xf32>
    %38 = vector.extract_strided_slice %35 {offsets = [0, 128], sizes = [32, 64], strides = [1, 1]} : vector<32x192xf32> to vector<32x64xf32>
    %c0_14 = arith.constant 0 : index
    %c0_15 = arith.constant 0 : index
    %c0_16 = arith.constant 0 : index
    %39 = vector.load %arg5[%c0_14, %c0_15, %c0_16] : memref<2x64x32xf32, #tpu.memory_space<vmem>>, vector<1x64x32xf32>
    %40 = vector.shape_cast %39 : vector<1x64x32xf32> to vector<64x32xf32>
    %c0_17 = arith.constant 0 : index
    %c0_18 = arith.constant 0 : index
    %c0_19 = arith.constant 0 : index
    %41 = vector.load %arg6[%c0_17, %c0_18, %c0_19] : memref<2x8x128xf32, #tpu.memory_space<vmem>>, vector<1x8x128xf32>
    %42 = vector.shape_cast %41 : vector<1x8x128xf32> to vector<8x128xf32>
    %43 = vector.extract_strided_slice %42 {offsets = [0, 0], sizes = [1, 96], strides = [1, 1]} : vector<8x128xf32> to vector<1x96xf32>
    %44 = vector.extract_strided_slice %42 {offsets = [1, 0], sizes = [1, 32], strides = [1, 1]} : vector<8x128xf32> to vector<1x32xf32>
    %45 = vector.extract_strided_slice %42 {offsets = [2, 0], sizes = [1, 32], strides = [1, 1]} : vector<8x128xf32> to vector<1x32xf32>
    %46 = vector.extract_strided_slice %42 {offsets = [3, 0], sizes = [1, 32], strides = [1, 1]} : vector<8x128xf32> to vector<1x32xf32>
    %47 = vector.extract_strided_slice %42 {offsets = [4, 0], sizes = [1, 64], strides = [1, 1]} : vector<8x128xf32> to vector<1x64xf32>
    %48 = vector.extract_strided_slice %42 {offsets = [5, 0], sizes = [1, 32], strides = [1, 1]} : vector<8x128xf32> to vector<1x32xf32>
    %49 = vector.extract_strided_slice %42 {offsets = [6, 0], sizes = [1, 32], strides = [1, 1]} : vector<8x128xf32> to vector<1x32xf32>
    %50 = vector.extract_strided_slice %42 {offsets = [7, 0], sizes = [1, 32], strides = [1, 1]} : vector<8x128xf32> to vector<1x32xf32>
    %cst_20 = arith.constant dense<0.000000e+00> : vector<16x96xf32>
    %51 = tpu.matmul %27, %36, %cst_20 {dimension_numbers = #tpu.dot_dimension_numbers<[1], [0], [0], [1], [0, 0, 1, 1], [], []>} : vector<16x32xf32>, vector<32x96xf32>, vector<16x96xf32> -> vector<16x96xf32>
    %52 = vector.broadcast %43 : vector<1x96xf32> to vector<16x96xf32>
    %53 = arith.addf %51, %52 : vector<16x96xf32>
    %54 = vector.extract_strided_slice %53 {offsets = [0, 0], sizes = [16, 8], strides = [1, 1]} : vector<16x96xf32> to vector<16x8xf32>
    %55 = vector.shape_cast %54 : vector<16x8xf32> to vector<2x8x8xf32>
    %56 = vector.extract_strided_slice %53 {offsets = [0, 32], sizes = [16, 8], strides = [1, 1]} : vector<16x96xf32> to vector<16x8xf32>
    %57 = vector.shape_cast %56 : vector<16x8xf32> to vector<2x8x8xf32>
    %58 = vector.extract_strided_slice %53 {offsets = [0, 64], sizes = [16, 8], strides = [1, 1]} : vector<16x96xf32> to vector<16x8xf32>
    %59 = vector.shape_cast %58 : vector<16x8xf32> to vector<2x8x8xf32>
    "tpu.trace_start"() <{level = 10 : i32, message = "bqd,bkd->bqk"}> : () -> ()
    %cst_21 = arith.constant dense<0.000000e+00> : vector<2x8x8xf32>
    %60 = tpu.matmul %55, %57, %cst_21 {dimension_numbers = #tpu.dot_dimension_numbers<[2], [2], [1], [1], [0, 0, 0, 1, 1, 1], [0], [0]>} : vector<2x8x8xf32>, vector<2x8x8xf32>, vector<2x8x8xf32> -> vector<2x8x8xf32>
    "tpu.trace_stop"() : () -> ()
    %cst_22 = arith.constant 0.353553385 : f32
    %61 = vector.broadcast %cst_22 : f32 to vector<2x8x8xf32>
    %62 = arith.mulf %60, %61 : vector<2x8x8xf32>
    %63 = vector.broadcast %33 : vector<2x1x8xf32> to vector<2x8x8xf32>
    %64 = arith.addf %62, %63 : vector<2x8x8xf32>
    %cst_23 = arith.constant dense<0xFF800000> : vector<2x8xf32>
    %65 = vector.multi_reduction <maximumf>, %64, %cst_23 [2] : vector<2x8x8xf32> to vector<2x8xf32>
    %66 = vector.shape_cast %65 : vector<2x8xf32> to vector<2x8x1xf32>
    %67 = vector.broadcast %66 : vector<2x8x1xf32> to vector<2x8x8xf32>
    %68 = arith.subf %64, %67 : vector<2x8x8xf32>
    %69 = math.exp %68 : vector<2x8x8xf32>
    %cst_24 = arith.constant dense<0.000000e+00> : vector<2x8xf32>
    %70 = vector.multi_reduction <add>, %69, %cst_24 [2] : vector<2x8x8xf32> to vector<2x8xf32>
    %71 = vector.shape_cast %70 : vector<2x8xf32> to vector<2x8x1xf32>
    %72 = tpu.reciprocal %71 {approx = true} : vector<2x8x1xf32> -> vector<2x8x1xf32>
    %73 = vector.broadcast %72 : vector<2x8x1xf32> to vector<2x8x8xf32>
    %74 = arith.mulf %69, %73 : vector<2x8x8xf32>
    "tpu.trace_start"() <{level = 10 : i32, message = "bqk,bkd->bqd"}> : () -> ()
    %cst_25 = arith.constant dense<0.000000e+00> : vector<2x8x8xf32>
    %75 = tpu.matmul %74, %59, %cst_25 {dimension_numbers = #tpu.dot_dimension_numbers<[2], [1], [1], [2], [0, 0, 0, 1, 1, 2], [0], [0]>} : vector<2x8x8xf32>, vector<2x8x8xf32>, vector<2x8x8xf32> -> vector<2x8x8xf32>
    "tpu.trace_stop"() : () -> ()
    %76 = vector.extract_strided_slice %53 {offsets = [0, 8], sizes = [16, 8], strides = [1, 1]} : vector<16x96xf32> to vector<16x8xf32>
    %77 = vector.shape_cast %76 : vector<16x8xf32> to vector<2x8x8xf32>
    %78 = vector.extract_strided_slice %53 {offsets = [0, 40], sizes = [16, 8], strides = [1, 1]} : vector<16x96xf32> to vector<16x8xf32>
    %79 = vector.shape_cast %78 : vector<16x8xf32> to vector<2x8x8xf32>
    %80 = vector.extract_strided_slice %53 {offsets = [0, 72], sizes = [16, 8], strides = [1, 1]} : vector<16x96xf32> to vector<16x8xf32>
    %81 = vector.shape_cast %80 : vector<16x8xf32> to vector<2x8x8xf32>
    "tpu.trace_start"() <{level = 10 : i32, message = "bqd,bkd->bqk"}> : () -> ()
    %cst_26 = arith.constant dense<0.000000e+00> : vector<2x8x8xf32>
    %82 = tpu.matmul %77, %79, %cst_26 {dimension_numbers = #tpu.dot_dimension_numbers<[2], [2], [1], [1], [0, 0, 0, 1, 1, 1], [0], [0]>} : vector<2x8x8xf32>, vector<2x8x8xf32>, vector<2x8x8xf32> -> vector<2x8x8xf32>
    "tpu.trace_stop"() : () -> ()
    %cst_27 = arith.constant 0.353553385 : f32
    %83 = vector.broadcast %cst_27 : f32 to vector<2x8x8xf32>
    %84 = arith.mulf %82, %83 : vector<2x8x8xf32>
    %85 = vector.broadcast %33 : vector<2x1x8xf32> to vector<2x8x8xf32>
    %86 = arith.addf %84, %85 : vector<2x8x8xf32>
    %cst_28 = arith.constant dense<0xFF800000> : vector<2x8xf32>
    %87 = vector.multi_reduction <maximumf>, %86, %cst_28 [2] : vector<2x8x8xf32> to vector<2x8xf32>
    %88 = vector.shape_cast %87 : vector<2x8xf32> to vector<2x8x1xf32>
    %89 = vector.broadcast %88 : vector<2x8x1xf32> to vector<2x8x8xf32>
    %90 = arith.subf %86, %89 : vector<2x8x8xf32>
    %91 = math.exp %90 : vector<2x8x8xf32>
    %cst_29 = arith.constant dense<0.000000e+00> : vector<2x8xf32>
    %92 = vector.multi_reduction <add>, %91, %cst_29 [2] : vector<2x8x8xf32> to vector<2x8xf32>
    %93 = vector.shape_cast %92 : vector<2x8xf32> to vector<2x8x1xf32>
    %94 = tpu.reciprocal %93 {approx = true} : vector<2x8x1xf32> -> vector<2x8x1xf32>
    %95 = vector.broadcast %94 : vector<2x8x1xf32> to vector<2x8x8xf32>
    %96 = arith.mulf %91, %95 : vector<2x8x8xf32>
    "tpu.trace_start"() <{level = 10 : i32, message = "bqk,bkd->bqd"}> : () -> ()
    %cst_30 = arith.constant dense<0.000000e+00> : vector<2x8x8xf32>
    %97 = tpu.matmul %96, %81, %cst_30 {dimension_numbers = #tpu.dot_dimension_numbers<[2], [1], [1], [2], [0, 0, 0, 1, 1, 2], [0], [0]>} : vector<2x8x8xf32>, vector<2x8x8xf32>, vector<2x8x8xf32> -> vector<2x8x8xf32>
    "tpu.trace_stop"() : () -> ()
    %98 = vector.extract_strided_slice %53 {offsets = [0, 16], sizes = [16, 8], strides = [1, 1]} : vector<16x96xf32> to vector<16x8xf32>
    %99 = vector.shape_cast %98 : vector<16x8xf32> to vector<2x8x8xf32>
    %100 = vector.extract_strided_slice %53 {offsets = [0, 48], sizes = [16, 8], strides = [1, 1]} : vector<16x96xf32> to vector<16x8xf32>
    %101 = vector.shape_cast %100 : vector<16x8xf32> to vector<2x8x8xf32>
    %102 = vector.extract_strided_slice %53 {offsets = [0, 80], sizes = [16, 8], strides = [1, 1]} : vector<16x96xf32> to vector<16x8xf32>
    %103 = vector.shape_cast %102 : vector<16x8xf32> to vector<2x8x8xf32>
    "tpu.trace_start"() <{level = 10 : i32, message = "bqd,bkd->bqk"}> : () -> ()
    %cst_31 = arith.constant dense<0.000000e+00> : vector<2x8x8xf32>
    %104 = tpu.matmul %99, %101, %cst_31 {dimension_numbers = #tpu.dot_dimension_numbers<[2], [2], [1], [1], [0, 0, 0, 1, 1, 1], [0], [0]>} : vector<2x8x8xf32>, vector<2x8x8xf32>, vector<2x8x8xf32> -> vector<2x8x8xf32>
    "tpu.trace_stop"() : () -> ()
    %cst_32 = arith.constant 0.353553385 : f32
    %105 = vector.broadcast %cst_32 : f32 to vector<2x8x8xf32>
    %106 = arith.mulf %104, %105 : vector<2x8x8xf32>
    %107 = vector.broadcast %33 : vector<2x1x8xf32> to vector<2x8x8xf32>
    %108 = arith.addf %106, %107 : vector<2x8x8xf32>
    %cst_33 = arith.constant dense<0xFF800000> : vector<2x8xf32>
    %109 = vector.multi_reduction <maximumf>, %108, %cst_33 [2] : vector<2x8x8xf32> to vector<2x8xf32>
    %110 = vector.shape_cast %109 : vector<2x8xf32> to vector<2x8x1xf32>
    %111 = vector.broadcast %110 : vector<2x8x1xf32> to vector<2x8x8xf32>
    %112 = arith.subf %108, %111 : vector<2x8x8xf32>
    %113 = math.exp %112 : vector<2x8x8xf32>
    %cst_34 = arith.constant dense<0.000000e+00> : vector<2x8xf32>
    %114 = vector.multi_reduction <add>, %113, %cst_34 [2] : vector<2x8x8xf32> to vector<2x8xf32>
    %115 = vector.shape_cast %114 : vector<2x8xf32> to vector<2x8x1xf32>
    %116 = tpu.reciprocal %115 {approx = true} : vector<2x8x1xf32> -> vector<2x8x1xf32>
    %117 = vector.broadcast %116 : vector<2x8x1xf32> to vector<2x8x8xf32>
    %118 = arith.mulf %113, %117 : vector<2x8x8xf32>
    "tpu.trace_start"() <{level = 10 : i32, message = "bqk,bkd->bqd"}> : () -> ()
    %cst_35 = arith.constant dense<0.000000e+00> : vector<2x8x8xf32>
    %119 = tpu.matmul %118, %103, %cst_35 {dimension_numbers = #tpu.dot_dimension_numbers<[2], [1], [1], [2], [0, 0, 0, 1, 1, 2], [0], [0]>} : vector<2x8x8xf32>, vector<2x8x8xf32>, vector<2x8x8xf32> -> vector<2x8x8xf32>
    "tpu.trace_stop"() : () -> ()
    %120 = vector.extract_strided_slice %53 {offsets = [0, 24], sizes = [16, 8], strides = [1, 1]} : vector<16x96xf32> to vector<16x8xf32>
    %121 = vector.shape_cast %120 : vector<16x8xf32> to vector<2x8x8xf32>
    %122 = vector.extract_strided_slice %53 {offsets = [0, 56], sizes = [16, 8], strides = [1, 1]} : vector<16x96xf32> to vector<16x8xf32>
    %123 = vector.shape_cast %122 : vector<16x8xf32> to vector<2x8x8xf32>
    %124 = vector.extract_strided_slice %53 {offsets = [0, 88], sizes = [16, 8], strides = [1, 1]} : vector<16x96xf32> to vector<16x8xf32>
    %125 = vector.shape_cast %124 : vector<16x8xf32> to vector<2x8x8xf32>
    "tpu.trace_start"() <{level = 10 : i32, message = "bqd,bkd->bqk"}> : () -> ()
    %cst_36 = arith.constant dense<0.000000e+00> : vector<2x8x8xf32>
    %126 = tpu.matmul %121, %123, %cst_36 {dimension_numbers = #tpu.dot_dimension_numbers<[2], [2], [1], [1], [0, 0, 0, 1, 1, 1], [0], [0]>} : vector<2x8x8xf32>, vector<2x8x8xf32>, vector<2x8x8xf32> -> vector<2x8x8xf32>
    "tpu.trace_stop"() : () -> ()
    %cst_37 = arith.constant 0.353553385 : f32
    %127 = vector.broadcast %cst_37 : f32 to vector<2x8x8xf32>
    %128 = arith.mulf %126, %127 : vector<2x8x8xf32>
    %129 = vector.broadcast %33 : vector<2x1x8xf32> to vector<2x8x8xf32>
    %130 = arith.addf %128, %129 : vector<2x8x8xf32>
    %cst_38 = arith.constant dense<0xFF800000> : vector<2x8xf32>
    %131 = vector.multi_reduction <maximumf>, %130, %cst_38 [2] : vector<2x8x8xf32> to vector<2x8xf32>
    %132 = vector.shape_cast %131 : vector<2x8xf32> to vector<2x8x1xf32>
    %133 = vector.broadcast %132 : vector<2x8x1xf32> to vector<2x8x8xf32>
    %134 = arith.subf %130, %133 : vector<2x8x8xf32>
    %135 = math.exp %134 : vector<2x8x8xf32>
    %cst_39 = arith.constant dense<0.000000e+00> : vector<2x8xf32>
    %136 = vector.multi_reduction <add>, %135, %cst_39 [2] : vector<2x8x8xf32> to vector<2x8xf32>
    %137 = vector.shape_cast %136 : vector<2x8xf32> to vector<2x8x1xf32>
    %138 = tpu.reciprocal %137 {approx = true} : vector<2x8x1xf32> -> vector<2x8x1xf32>
    %139 = vector.broadcast %138 : vector<2x8x1xf32> to vector<2x8x8xf32>
    %140 = arith.mulf %135, %139 : vector<2x8x8xf32>
    "tpu.trace_start"() <{level = 10 : i32, message = "bqk,bkd->bqd"}> : () -> ()
    %cst_40 = arith.constant dense<0.000000e+00> : vector<2x8x8xf32>
    %141 = tpu.matmul %140, %125, %cst_40 {dimension_numbers = #tpu.dot_dimension_numbers<[2], [1], [1], [2], [0, 0, 0, 1, 1, 2], [0], [0]>} : vector<2x8x8xf32>, vector<2x8x8xf32>, vector<2x8x8xf32> -> vector<2x8x8xf32>
    "tpu.trace_stop"() : () -> ()
    %142 = tpu.concatenate %75, %97, %119, %141 in 2 : vector<2x8x8xf32>, vector<2x8x8xf32>, vector<2x8x8xf32>, vector<2x8x8xf32> -> vector<2x8x32xf32>
    %143 = vector.shape_cast %142 : vector<2x8x32xf32> to vector<16x32xf32>
    %cst_41 = arith.constant dense<0.000000e+00> : vector<16x32xf32>
    %144 = tpu.matmul %143, %37, %cst_41 {dimension_numbers = #tpu.dot_dimension_numbers<[1], [0], [0], [1], [0, 0, 1, 1], [], []>} : vector<16x32xf32>, vector<32x32xf32>, vector<16x32xf32> -> vector<16x32xf32>
    %145 = vector.broadcast %44 : vector<1x32xf32> to vector<16x32xf32>
    %146 = arith.addf %144, %145 : vector<16x32xf32>
    %147 = arith.addf %146, %27 : vector<16x32xf32>
    %cst_42 = arith.constant dense<0.000000e+00> : vector<16xf32>
    %148 = vector.multi_reduction <add>, %147, %cst_42 [1] : vector<16x32xf32> to vector<16xf32>
    %149 = vector.shape_cast %148 : vector<16xf32> to vector<16x1xf32>
    %cst_43 = arith.constant 3.200000e+01 : f32
    %150 = vector.broadcast %cst_43 : f32 to vector<16x1xf32>
    %151 = arith.divf %149, %150 : vector<16x1xf32>
    %152 = vector.broadcast %151 : vector<16x1xf32> to vector<16x32xf32>
    %153 = arith.subf %147, %152 : vector<16x32xf32>
    %154 = arith.mulf %153, %153 : vector<16x32xf32>
    %cst_44 = arith.constant dense<0.000000e+00> : vector<16xf32>
    %155 = vector.multi_reduction <add>, %154, %cst_44 [1] : vector<16x32xf32> to vector<16xf32>
    %156 = vector.shape_cast %155 : vector<16xf32> to vector<16x1xf32>
    %cst_45 = arith.constant 3.200000e+01 : f32
    %157 = vector.broadcast %cst_45 : f32 to vector<16x1xf32>
    %158 = arith.divf %156, %157 : vector<16x1xf32>
    %159 = vector.broadcast %151 : vector<16x1xf32> to vector<16x32xf32>
    %160 = arith.subf %147, %159 : vector<16x32xf32>
    %cst_46 = arith.constant 9.99999996E-13 : f32
    %161 = vector.broadcast %cst_46 : f32 to vector<16x1xf32>
    %162 = arith.addf %158, %161 : vector<16x1xf32>
    %163 = math.rsqrt %162 : vector<16x1xf32>
    %164 = vector.broadcast %163 : vector<16x1xf32> to vector<16x32xf32>
    %165 = arith.mulf %160, %164 : vector<16x32xf32>
    %166 = vector.broadcast %45 : vector<1x32xf32> to vector<16x32xf32>
    %167 = arith.mulf %165, %166 : vector<16x32xf32>
    %168 = vector.broadcast %46 : vector<1x32xf32> to vector<16x32xf32>
    %169 = arith.addf %167, %168 : vector<16x32xf32>
    %cst_47 = arith.constant dense<0.000000e+00> : vector<16x64xf32>
    %170 = tpu.matmul %169, %38, %cst_47 {dimension_numbers = #tpu.dot_dimension_numbers<[1], [0], [0], [1], [0, 0, 1, 1], [], []>} : vector<16x32xf32>, vector<32x64xf32>, vector<16x64xf32> -> vector<16x64xf32>
    %171 = vector.broadcast %47 : vector<1x64xf32> to vector<16x64xf32>
    %172 = arith.addf %170, %171 : vector<16x64xf32>
    %cst_48 = arith.constant 5.000000e-01 : f32
    %173 = vector.broadcast %cst_48 : f32 to vector<16x64xf32>
    %174 = arith.mulf %173, %172 : vector<16x64xf32>
    %cst_49 = arith.constant 4.471500e-02 : f32
    %175 = vector.broadcast %cst_49 : f32 to vector<16x64xf32>
    %176 = arith.mulf %175, %172 : vector<16x64xf32>
    %177 = arith.mulf %176, %172 : vector<16x64xf32>
    %178 = arith.mulf %177, %172 : vector<16x64xf32>
    %179 = arith.addf %172, %178 : vector<16x64xf32>
    %cst_50 = arith.constant 0.797884583 : f32
    %180 = vector.broadcast %cst_50 : f32 to vector<16x64xf32>
    %181 = arith.mulf %180, %179 : vector<16x64xf32>
    %182 = math.tanh %181 : vector<16x64xf32>
    %cst_51 = arith.constant 1.000000e+00 : f32
    %183 = vector.broadcast %cst_51 : f32 to vector<16x64xf32>
    %184 = arith.addf %183, %182 : vector<16x64xf32>
    %185 = arith.mulf %174, %184 : vector<16x64xf32>
    %cst_52 = arith.constant dense<0.000000e+00> : vector<16x32xf32>
    %186 = tpu.matmul %185, %40, %cst_52 {dimension_numbers = #tpu.dot_dimension_numbers<[1], [0], [0], [1], [0, 0, 1, 1], [], []>} : vector<16x64xf32>, vector<64x32xf32>, vector<16x32xf32> -> vector<16x32xf32>
    %187 = vector.broadcast %48 : vector<1x32xf32> to vector<16x32xf32>
    %188 = arith.addf %186, %187 : vector<16x32xf32>
    %189 = arith.addf %188, %169 : vector<16x32xf32>
    %cst_53 = arith.constant dense<0.000000e+00> : vector<16xf32>
    %190 = vector.multi_reduction <add>, %189, %cst_53 [1] : vector<16x32xf32> to vector<16xf32>
    %191 = vector.shape_cast %190 : vector<16xf32> to vector<16x1xf32>
    %cst_54 = arith.constant 3.200000e+01 : f32
    %192 = vector.broadcast %cst_54 : f32 to vector<16x1xf32>
    %193 = arith.divf %191, %192 : vector<16x1xf32>
    %194 = vector.broadcast %193 : vector<16x1xf32> to vector<16x32xf32>
    %195 = arith.subf %189, %194 : vector<16x32xf32>
    %196 = arith.mulf %195, %195 : vector<16x32xf32>
    %cst_55 = arith.constant dense<0.000000e+00> : vector<16xf32>
    %197 = vector.multi_reduction <add>, %196, %cst_55 [1] : vector<16x32xf32> to vector<16xf32>
    %198 = vector.shape_cast %197 : vector<16xf32> to vector<16x1xf32>
    %cst_56 = arith.constant 3.200000e+01 : f32
    %199 = vector.broadcast %cst_56 : f32 to vector<16x1xf32>
    %200 = arith.divf %198, %199 : vector<16x1xf32>
    %201 = vector.broadcast %193 : vector<16x1xf32> to vector<16x32xf32>
    %202 = arith.subf %189, %201 : vector<16x32xf32>
    %cst_57 = arith.constant 9.99999996E-13 : f32
    %203 = vector.broadcast %cst_57 : f32 to vector<16x1xf32>
    %204 = arith.addf %200, %203 : vector<16x1xf32>
    %205 = math.rsqrt %204 : vector<16x1xf32>
    %206 = vector.broadcast %205 : vector<16x1xf32> to vector<16x32xf32>
    %207 = arith.mulf %202, %206 : vector<16x32xf32>
    %208 = vector.broadcast %49 : vector<1x32xf32> to vector<16x32xf32>
    %209 = arith.mulf %207, %208 : vector<16x32xf32>
    %210 = vector.broadcast %50 : vector<1x32xf32> to vector<16x32xf32>
    %211 = arith.addf %209, %210 : vector<16x32xf32>
    %c1 = arith.constant 1 : index
    %c0_58 = arith.constant 0 : index
    %c0_59 = arith.constant 0 : index
    %212 = vector.load %arg4[%c1, %c0_58, %c0_59] : memref<2x32x192xf32, #tpu.memory_space<vmem>>, vector<1x32x192xf32>
    %213 = vector.shape_cast %212 : vector<1x32x192xf32> to vector<32x192xf32>
    %214 = vector.extract_strided_slice %213 {offsets = [0, 0], sizes = [32, 96], strides = [1, 1]} : vector<32x192xf32> to vector<32x96xf32>
    %215 = vector.extract_strided_slice %213 {offsets = [0, 96], sizes = [32, 32], strides = [1, 1]} : vector<32x192xf32> to vector<32x32xf32>
    %216 = vector.extract_strided_slice %213 {offsets = [0, 128], sizes = [32, 64], strides = [1, 1]} : vector<32x192xf32> to vector<32x64xf32>
    %c1_60 = arith.constant 1 : index
    %c0_61 = arith.constant 0 : index
    %c0_62 = arith.constant 0 : index
    %217 = vector.load %arg5[%c1_60, %c0_61, %c0_62] : memref<2x64x32xf32, #tpu.memory_space<vmem>>, vector<1x64x32xf32>
    %218 = vector.shape_cast %217 : vector<1x64x32xf32> to vector<64x32xf32>
    %c1_63 = arith.constant 1 : index
    %c0_64 = arith.constant 0 : index
    %c0_65 = arith.constant 0 : index
    %219 = vector.load %arg6[%c1_63, %c0_64, %c0_65] : memref<2x8x128xf32, #tpu.memory_space<vmem>>, vector<1x8x128xf32>
    %220 = vector.shape_cast %219 : vector<1x8x128xf32> to vector<8x128xf32>
    %221 = vector.extract_strided_slice %220 {offsets = [0, 0], sizes = [1, 96], strides = [1, 1]} : vector<8x128xf32> to vector<1x96xf32>
    %222 = vector.extract_strided_slice %220 {offsets = [1, 0], sizes = [1, 32], strides = [1, 1]} : vector<8x128xf32> to vector<1x32xf32>
    %223 = vector.extract_strided_slice %220 {offsets = [2, 0], sizes = [1, 32], strides = [1, 1]} : vector<8x128xf32> to vector<1x32xf32>
    %224 = vector.extract_strided_slice %220 {offsets = [3, 0], sizes = [1, 32], strides = [1, 1]} : vector<8x128xf32> to vector<1x32xf32>
    %225 = vector.extract_strided_slice %220 {offsets = [4, 0], sizes = [1, 64], strides = [1, 1]} : vector<8x128xf32> to vector<1x64xf32>
    %226 = vector.extract_strided_slice %220 {offsets = [5, 0], sizes = [1, 32], strides = [1, 1]} : vector<8x128xf32> to vector<1x32xf32>
    %227 = vector.extract_strided_slice %220 {offsets = [6, 0], sizes = [1, 32], strides = [1, 1]} : vector<8x128xf32> to vector<1x32xf32>
    %228 = vector.extract_strided_slice %220 {offsets = [7, 0], sizes = [1, 32], strides = [1, 1]} : vector<8x128xf32> to vector<1x32xf32>
    %cst_66 = arith.constant dense<0.000000e+00> : vector<16x96xf32>
    %229 = tpu.matmul %211, %214, %cst_66 {dimension_numbers = #tpu.dot_dimension_numbers<[1], [0], [0], [1], [0, 0, 1, 1], [], []>} : vector<16x32xf32>, vector<32x96xf32>, vector<16x96xf32> -> vector<16x96xf32>
    %230 = vector.broadcast %221 : vector<1x96xf32> to vector<16x96xf32>
    %231 = arith.addf %229, %230 : vector<16x96xf32>
    %232 = vector.extract_strided_slice %231 {offsets = [0, 0], sizes = [16, 8], strides = [1, 1]} : vector<16x96xf32> to vector<16x8xf32>
    %233 = vector.shape_cast %232 : vector<16x8xf32> to vector<2x8x8xf32>
    %234 = vector.extract_strided_slice %231 {offsets = [0, 32], sizes = [16, 8], strides = [1, 1]} : vector<16x96xf32> to vector<16x8xf32>
    %235 = vector.shape_cast %234 : vector<16x8xf32> to vector<2x8x8xf32>
    %236 = vector.extract_strided_slice %231 {offsets = [0, 64], sizes = [16, 8], strides = [1, 1]} : vector<16x96xf32> to vector<16x8xf32>
    %237 = vector.shape_cast %236 : vector<16x8xf32> to vector<2x8x8xf32>
    "tpu.trace_start"() <{level = 10 : i32, message = "bqd,bkd->bqk"}> : () -> ()
    %cst_67 = arith.constant dense<0.000000e+00> : vector<2x8x8xf32>
    %238 = tpu.matmul %233, %235, %cst_67 {dimension_numbers = #tpu.dot_dimension_numbers<[2], [2], [1], [1], [0, 0, 0, 1, 1, 1], [0], [0]>} : vector<2x8x8xf32>, vector<2x8x8xf32>, vector<2x8x8xf32> -> vector<2x8x8xf32>
    "tpu.trace_stop"() : () -> ()
    %cst_68 = arith.constant 0.353553385 : f32
    %239 = vector.broadcast %cst_68 : f32 to vector<2x8x8xf32>
    %240 = arith.mulf %238, %239 : vector<2x8x8xf32>
    %241 = vector.broadcast %33 : vector<2x1x8xf32> to vector<2x8x8xf32>
    %242 = arith.addf %240, %241 : vector<2x8x8xf32>
    %cst_69 = arith.constant dense<0xFF800000> : vector<2x8xf32>
    %243 = vector.multi_reduction <maximumf>, %242, %cst_69 [2] : vector<2x8x8xf32> to vector<2x8xf32>
    %244 = vector.shape_cast %243 : vector<2x8xf32> to vector<2x8x1xf32>
    %245 = vector.broadcast %244 : vector<2x8x1xf32> to vector<2x8x8xf32>
    %246 = arith.subf %242, %245 : vector<2x8x8xf32>
    %247 = math.exp %246 : vector<2x8x8xf32>
    %cst_70 = arith.constant dense<0.000000e+00> : vector<2x8xf32>
    %248 = vector.multi_reduction <add>, %247, %cst_70 [2] : vector<2x8x8xf32> to vector<2x8xf32>
    %249 = vector.shape_cast %248 : vector<2x8xf32> to vector<2x8x1xf32>
    %250 = tpu.reciprocal %249 {approx = true} : vector<2x8x1xf32> -> vector<2x8x1xf32>
    %251 = vector.broadcast %250 : vector<2x8x1xf32> to vector<2x8x8xf32>
    %252 = arith.mulf %247, %251 : vector<2x8x8xf32>
    "tpu.trace_start"() <{level = 10 : i32, message = "bqk,bkd->bqd"}> : () -> ()
    %cst_71 = arith.constant dense<0.000000e+00> : vector<2x8x8xf32>
    %253 = tpu.matmul %252, %237, %cst_71 {dimension_numbers = #tpu.dot_dimension_numbers<[2], [1], [1], [2], [0, 0, 0, 1, 1, 2], [0], [0]>} : vector<2x8x8xf32>, vector<2x8x8xf32>, vector<2x8x8xf32> -> vector<2x8x8xf32>
    "tpu.trace_stop"() : () -> ()
    %254 = vector.extract_strided_slice %231 {offsets = [0, 8], sizes = [16, 8], strides = [1, 1]} : vector<16x96xf32> to vector<16x8xf32>
    %255 = vector.shape_cast %254 : vector<16x8xf32> to vector<2x8x8xf32>
    %256 = vector.extract_strided_slice %231 {offsets = [0, 40], sizes = [16, 8], strides = [1, 1]} : vector<16x96xf32> to vector<16x8xf32>
    %257 = vector.shape_cast %256 : vector<16x8xf32> to vector<2x8x8xf32>
    %258 = vector.extract_strided_slice %231 {offsets = [0, 72], sizes = [16, 8], strides = [1, 1]} : vector<16x96xf32> to vector<16x8xf32>
    %259 = vector.shape_cast %258 : vector<16x8xf32> to vector<2x8x8xf32>
    "tpu.trace_start"() <{level = 10 : i32, message = "bqd,bkd->bqk"}> : () -> ()
    %cst_72 = arith.constant dense<0.000000e+00> : vector<2x8x8xf32>
    %260 = tpu.matmul %255, %257, %cst_72 {dimension_numbers = #tpu.dot_dimension_numbers<[2], [2], [1], [1], [0, 0, 0, 1, 1, 1], [0], [0]>} : vector<2x8x8xf32>, vector<2x8x8xf32>, vector<2x8x8xf32> -> vector<2x8x8xf32>
    "tpu.trace_stop"() : () -> ()
    %cst_73 = arith.constant 0.353553385 : f32
    %261 = vector.broadcast %cst_73 : f32 to vector<2x8x8xf32>
    %262 = arith.mulf %260, %261 : vector<2x8x8xf32>
    %263 = vector.broadcast %33 : vector<2x1x8xf32> to vector<2x8x8xf32>
    %264 = arith.addf %262, %263 : vector<2x8x8xf32>
    %cst_74 = arith.constant dense<0xFF800000> : vector<2x8xf32>
    %265 = vector.multi_reduction <maximumf>, %264, %cst_74 [2] : vector<2x8x8xf32> to vector<2x8xf32>
    %266 = vector.shape_cast %265 : vector<2x8xf32> to vector<2x8x1xf32>
    %267 = vector.broadcast %266 : vector<2x8x1xf32> to vector<2x8x8xf32>
    %268 = arith.subf %264, %267 : vector<2x8x8xf32>
    %269 = math.exp %268 : vector<2x8x8xf32>
    %cst_75 = arith.constant dense<0.000000e+00> : vector<2x8xf32>
    %270 = vector.multi_reduction <add>, %269, %cst_75 [2] : vector<2x8x8xf32> to vector<2x8xf32>
    %271 = vector.shape_cast %270 : vector<2x8xf32> to vector<2x8x1xf32>
    %272 = tpu.reciprocal %271 {approx = true} : vector<2x8x1xf32> -> vector<2x8x1xf32>
    %273 = vector.broadcast %272 : vector<2x8x1xf32> to vector<2x8x8xf32>
    %274 = arith.mulf %269, %273 : vector<2x8x8xf32>
    "tpu.trace_start"() <{level = 10 : i32, message = "bqk,bkd->bqd"}> : () -> ()
    %cst_76 = arith.constant dense<0.000000e+00> : vector<2x8x8xf32>
    %275 = tpu.matmul %274, %259, %cst_76 {dimension_numbers = #tpu.dot_dimension_numbers<[2], [1], [1], [2], [0, 0, 0, 1, 1, 2], [0], [0]>} : vector<2x8x8xf32>, vector<2x8x8xf32>, vector<2x8x8xf32> -> vector<2x8x8xf32>
    "tpu.trace_stop"() : () -> ()
    %276 = vector.extract_strided_slice %231 {offsets = [0, 16], sizes = [16, 8], strides = [1, 1]} : vector<16x96xf32> to vector<16x8xf32>
    %277 = vector.shape_cast %276 : vector<16x8xf32> to vector<2x8x8xf32>
    %278 = vector.extract_strided_slice %231 {offsets = [0, 48], sizes = [16, 8], strides = [1, 1]} : vector<16x96xf32> to vector<16x8xf32>
    %279 = vector.shape_cast %278 : vector<16x8xf32> to vector<2x8x8xf32>
    %280 = vector.extract_strided_slice %231 {offsets = [0, 80], sizes = [16, 8], strides = [1, 1]} : vector<16x96xf32> to vector<16x8xf32>
    %281 = vector.shape_cast %280 : vector<16x8xf32> to vector<2x8x8xf32>
    "tpu.trace_start"() <{level = 10 : i32, message = "bqd,bkd->bqk"}> : () -> ()
    %cst_77 = arith.constant dense<0.000000e+00> : vector<2x8x8xf32>
    %282 = tpu.matmul %277, %279, %cst_77 {dimension_numbers = #tpu.dot_dimension_numbers<[2], [2], [1], [1], [0, 0, 0, 1, 1, 1], [0], [0]>} : vector<2x8x8xf32>, vector<2x8x8xf32>, vector<2x8x8xf32> -> vector<2x8x8xf32>
    "tpu.trace_stop"() : () -> ()
    %cst_78 = arith.constant 0.353553385 : f32
    %283 = vector.broadcast %cst_78 : f32 to vector<2x8x8xf32>
    %284 = arith.mulf %282, %283 : vector<2x8x8xf32>
    %285 = vector.broadcast %33 : vector<2x1x8xf32> to vector<2x8x8xf32>
    %286 = arith.addf %284, %285 : vector<2x8x8xf32>
    %cst_79 = arith.constant dense<0xFF800000> : vector<2x8xf32>
    %287 = vector.multi_reduction <maximumf>, %286, %cst_79 [2] : vector<2x8x8xf32> to vector<2x8xf32>
    %288 = vector.shape_cast %287 : vector<2x8xf32> to vector<2x8x1xf32>
    %289 = vector.broadcast %288 : vector<2x8x1xf32> to vector<2x8x8xf32>
    %290 = arith.subf %286, %289 : vector<2x8x8xf32>
    %291 = math.exp %290 : vector<2x8x8xf32>
    %cst_80 = arith.constant dense<0.000000e+00> : vector<2x8xf32>
    %292 = vector.multi_reduction <add>, %291, %cst_80 [2] : vector<2x8x8xf32> to vector<2x8xf32>
    %293 = vector.shape_cast %292 : vector<2x8xf32> to vector<2x8x1xf32>
    %294 = tpu.reciprocal %293 {approx = true} : vector<2x8x1xf32> -> vector<2x8x1xf32>
    %295 = vector.broadcast %294 : vector<2x8x1xf32> to vector<2x8x8xf32>
    %296 = arith.mulf %291, %295 : vector<2x8x8xf32>
    "tpu.trace_start"() <{level = 10 : i32, message = "bqk,bkd->bqd"}> : () -> ()
    %cst_81 = arith.constant dense<0.000000e+00> : vector<2x8x8xf32>
    %297 = tpu.matmul %296, %281, %cst_81 {dimension_numbers = #tpu.dot_dimension_numbers<[2], [1], [1], [2], [0, 0, 0, 1, 1, 2], [0], [0]>} : vector<2x8x8xf32>, vector<2x8x8xf32>, vector<2x8x8xf32> -> vector<2x8x8xf32>
    "tpu.trace_stop"() : () -> ()
    %298 = vector.extract_strided_slice %231 {offsets = [0, 24], sizes = [16, 8], strides = [1, 1]} : vector<16x96xf32> to vector<16x8xf32>
    %299 = vector.shape_cast %298 : vector<16x8xf32> to vector<2x8x8xf32>
    %300 = vector.extract_strided_slice %231 {offsets = [0, 56], sizes = [16, 8], strides = [1, 1]} : vector<16x96xf32> to vector<16x8xf32>
    %301 = vector.shape_cast %300 : vector<16x8xf32> to vector<2x8x8xf32>
    %302 = vector.extract_strided_slice %231 {offsets = [0, 88], sizes = [16, 8], strides = [1, 1]} : vector<16x96xf32> to vector<16x8xf32>
    %303 = vector.shape_cast %302 : vector<16x8xf32> to vector<2x8x8xf32>
    "tpu.trace_start"() <{level = 10 : i32, message = "bqd,bkd->bqk"}> : () -> ()
    %cst_82 = arith.constant dense<0.000000e+00> : vector<2x8x8xf32>
    %304 = tpu.matmul %299, %301, %cst_82 {dimension_numbers = #tpu.dot_dimension_numbers<[2], [2], [1], [1], [0, 0, 0, 1, 1, 1], [0], [0]>} : vector<2x8x8xf32>, vector<2x8x8xf32>, vector<2x8x8xf32> -> vector<2x8x8xf32>
    "tpu.trace_stop"() : () -> ()
    %cst_83 = arith.constant 0.353553385 : f32
    %305 = vector.broadcast %cst_83 : f32 to vector<2x8x8xf32>
    %306 = arith.mulf %304, %305 : vector<2x8x8xf32>
    %307 = vector.broadcast %33 : vector<2x1x8xf32> to vector<2x8x8xf32>
    %308 = arith.addf %306, %307 : vector<2x8x8xf32>
    %cst_84 = arith.constant dense<0xFF800000> : vector<2x8xf32>
    %309 = vector.multi_reduction <maximumf>, %308, %cst_84 [2] : vector<2x8x8xf32> to vector<2x8xf32>
    %310 = vector.shape_cast %309 : vector<2x8xf32> to vector<2x8x1xf32>
    %311 = vector.broadcast %310 : vector<2x8x1xf32> to vector<2x8x8xf32>
    %312 = arith.subf %308, %311 : vector<2x8x8xf32>
    %313 = math.exp %312 : vector<2x8x8xf32>
    %cst_85 = arith.constant dense<0.000000e+00> : vector<2x8xf32>
    %314 = vector.multi_reduction <add>, %313, %cst_85 [2] : vector<2x8x8xf32> to vector<2x8xf32>
    %315 = vector.shape_cast %314 : vector<2x8xf32> to vector<2x8x1xf32>
    %316 = tpu.reciprocal %315 {approx = true} : vector<2x8x1xf32> -> vector<2x8x1xf32>
    %317 = vector.broadcast %316 : vector<2x8x1xf32> to vector<2x8x8xf32>
    %318 = arith.mulf %313, %317 : vector<2x8x8xf32>
    "tpu.trace_start"() <{level = 10 : i32, message = "bqk,bkd->bqd"}> : () -> ()
    %cst_86 = arith.constant dense<0.000000e+00> : vector<2x8x8xf32>
    %319 = tpu.matmul %318, %303, %cst_86 {dimension_numbers = #tpu.dot_dimension_numbers<[2], [1], [1], [2], [0, 0, 0, 1, 1, 2], [0], [0]>} : vector<2x8x8xf32>, vector<2x8x8xf32>, vector<2x8x8xf32> -> vector<2x8x8xf32>
    "tpu.trace_stop"() : () -> ()
    %320 = tpu.concatenate %253, %275, %297, %319 in 2 : vector<2x8x8xf32>, vector<2x8x8xf32>, vector<2x8x8xf32>, vector<2x8x8xf32> -> vector<2x8x32xf32>
    %321 = vector.shape_cast %320 : vector<2x8x32xf32> to vector<16x32xf32>
    %cst_87 = arith.constant dense<0.000000e+00> : vector<16x32xf32>
    %322 = tpu.matmul %321, %215, %cst_87 {dimension_numbers = #tpu.dot_dimension_numbers<[1], [0], [0], [1], [0, 0, 1, 1], [], []>} : vector<16x32xf32>, vector<32x32xf32>, vector<16x32xf32> -> vector<16x32xf32>
    %323 = vector.broadcast %222 : vector<1x32xf32> to vector<16x32xf32>
    %324 = arith.addf %322, %323 : vector<16x32xf32>
    %325 = arith.addf %324, %211 : vector<16x32xf32>
    %cst_88 = arith.constant dense<0.000000e+00> : vector<16xf32>
    %326 = vector.multi_reduction <add>, %325, %cst_88 [1] : vector<16x32xf32> to vector<16xf32>
    %327 = vector.shape_cast %326 : vector<16xf32> to vector<16x1xf32>
    %cst_89 = arith.constant 3.200000e+01 : f32
    %328 = vector.broadcast %cst_89 : f32 to vector<16x1xf32>
    %329 = arith.divf %327, %328 : vector<16x1xf32>
    %330 = vector.broadcast %329 : vector<16x1xf32> to vector<16x32xf32>
    %331 = arith.subf %325, %330 : vector<16x32xf32>
    %332 = arith.mulf %331, %331 : vector<16x32xf32>
    %cst_90 = arith.constant dense<0.000000e+00> : vector<16xf32>
    %333 = vector.multi_reduction <add>, %332, %cst_90 [1] : vector<16x32xf32> to vector<16xf32>
    %334 = vector.shape_cast %333 : vector<16xf32> to vector<16x1xf32>
    %cst_91 = arith.constant 3.200000e+01 : f32
    %335 = vector.broadcast %cst_91 : f32 to vector<16x1xf32>
    %336 = arith.divf %334, %335 : vector<16x1xf32>
    %337 = vector.broadcast %329 : vector<16x1xf32> to vector<16x32xf32>
    %338 = arith.subf %325, %337 : vector<16x32xf32>
    %cst_92 = arith.constant 9.99999996E-13 : f32
    %339 = vector.broadcast %cst_92 : f32 to vector<16x1xf32>
    %340 = arith.addf %336, %339 : vector<16x1xf32>
    %341 = math.rsqrt %340 : vector<16x1xf32>
    %342 = vector.broadcast %341 : vector<16x1xf32> to vector<16x32xf32>
    %343 = arith.mulf %338, %342 : vector<16x32xf32>
    %344 = vector.broadcast %223 : vector<1x32xf32> to vector<16x32xf32>
    %345 = arith.mulf %343, %344 : vector<16x32xf32>
    %346 = vector.broadcast %224 : vector<1x32xf32> to vector<16x32xf32>
    %347 = arith.addf %345, %346 : vector<16x32xf32>
    %cst_93 = arith.constant dense<0.000000e+00> : vector<16x64xf32>
    %348 = tpu.matmul %347, %216, %cst_93 {dimension_numbers = #tpu.dot_dimension_numbers<[1], [0], [0], [1], [0, 0, 1, 1], [], []>} : vector<16x32xf32>, vector<32x64xf32>, vector<16x64xf32> -> vector<16x64xf32>
    %349 = vector.broadcast %225 : vector<1x64xf32> to vector<16x64xf32>
    %350 = arith.addf %348, %349 : vector<16x64xf32>
    %cst_94 = arith.constant 5.000000e-01 : f32
    %351 = vector.broadcast %cst_94 : f32 to vector<16x64xf32>
    %352 = arith.mulf %351, %350 : vector<16x64xf32>
    %cst_95 = arith.constant 4.471500e-02 : f32
    %353 = vector.broadcast %cst_95 : f32 to vector<16x64xf32>
    %354 = arith.mulf %353, %350 : vector<16x64xf32>
    %355 = arith.mulf %354, %350 : vector<16x64xf32>
    %356 = arith.mulf %355, %350 : vector<16x64xf32>
    %357 = arith.addf %350, %356 : vector<16x64xf32>
    %cst_96 = arith.constant 0.797884583 : f32
    %358 = vector.broadcast %cst_96 : f32 to vector<16x64xf32>
    %359 = arith.mulf %358, %357 : vector<16x64xf32>
    %360 = math.tanh %359 : vector<16x64xf32>
    %cst_97 = arith.constant 1.000000e+00 : f32
    %361 = vector.broadcast %cst_97 : f32 to vector<16x64xf32>
    %362 = arith.addf %361, %360 : vector<16x64xf32>
    %363 = arith.mulf %352, %362 : vector<16x64xf32>
    %cst_98 = arith.constant dense<0.000000e+00> : vector<16x32xf32>
    %364 = tpu.matmul %363, %218, %cst_98 {dimension_numbers = #tpu.dot_dimension_numbers<[1], [0], [0], [1], [0, 0, 1, 1], [], []>} : vector<16x64xf32>, vector<64x32xf32>, vector<16x32xf32> -> vector<16x32xf32>
    %365 = vector.broadcast %226 : vector<1x32xf32> to vector<16x32xf32>
    %366 = arith.addf %364, %365 : vector<16x32xf32>
    %367 = arith.addf %366, %347 : vector<16x32xf32>
    %cst_99 = arith.constant dense<0.000000e+00> : vector<16xf32>
    %368 = vector.multi_reduction <add>, %367, %cst_99 [1] : vector<16x32xf32> to vector<16xf32>
    %369 = vector.shape_cast %368 : vector<16xf32> to vector<16x1xf32>
    %cst_100 = arith.constant 3.200000e+01 : f32
    %370 = vector.broadcast %cst_100 : f32 to vector<16x1xf32>
    %371 = arith.divf %369, %370 : vector<16x1xf32>
    %372 = vector.broadcast %371 : vector<16x1xf32> to vector<16x32xf32>
    %373 = arith.subf %367, %372 : vector<16x32xf32>
    %374 = arith.mulf %373, %373 : vector<16x32xf32>
    %cst_101 = arith.constant dense<0.000000e+00> : vector<16xf32>
    %375 = vector.multi_reduction <add>, %374, %cst_101 [1] : vector<16x32xf32> to vector<16xf32>
    %376 = vector.shape_cast %375 : vector<16xf32> to vector<16x1xf32>
    %cst_102 = arith.constant 3.200000e+01 : f32
    %377 = vector.broadcast %cst_102 : f32 to vector<16x1xf32>
    %378 = arith.divf %376, %377 : vector<16x1xf32>
    %379 = vector.broadcast %371 : vector<16x1xf32> to vector<16x32xf32>
    %380 = arith.subf %367, %379 : vector<16x32xf32>
    %cst_103 = arith.constant 9.99999996E-13 : f32
    %381 = vector.broadcast %cst_103 : f32 to vector<16x1xf32>
    %382 = arith.addf %378, %381 : vector<16x1xf32>
    %383 = math.rsqrt %382 : vector<16x1xf32>
    %384 = vector.broadcast %383 : vector<16x1xf32> to vector<16x32xf32>
    %385 = arith.mulf %380, %384 : vector<16x32xf32>
    %386 = vector.broadcast %227 : vector<1x32xf32> to vector<16x32xf32>
    %387 = arith.mulf %385, %386 : vector<16x32xf32>
    %388 = vector.broadcast %228 : vector<1x32xf32> to vector<16x32xf32>
    %389 = arith.addf %387, %388 : vector<16x32xf32>
    %390 = vector.shape_cast %389 : vector<16x32xf32> to vector<2x8x32xf32>
    %391 = vector.extract_strided_slice %390 {offsets = [0, 0, 0], sizes = [2, 1, 32], strides = [1, 1, 1]} : vector<2x8x32xf32> to vector<2x1x32xf32>
    %392 = vector.shape_cast %391 : vector<2x1x32xf32> to vector<2x32xf32>
    %cst_104 = arith.constant dense<0.000000e+00> : vector<2x2xf32>
    %393 = tpu.matmul %392, %4, %cst_104 {dimension_numbers = #tpu.dot_dimension_numbers<[1], [0], [0], [1], [0, 0, 1, 1], [], []>} : vector<2x32xf32>, vector<32x2xf32>, vector<2x2xf32> -> vector<2x2xf32>
    %394 = vector.broadcast %3 : vector<1x2xf32> to vector<2x2xf32>
    %395 = arith.addf %393, %394 : vector<2x2xf32>
    %c0_105 = arith.constant 0 : index
    %c0_106 = arith.constant 0 : index
    %396 = vector.load %arg7[%c0_105, %c0_106] : memref<2x2xf32, #tpu.memory_space<vmem>>, vector<2x2xf32>
    tpu.vector_store %arg7[%c0_105, %c0_106], %395 {strides = array<i32>} : memref<2x2xf32, #tpu.memory_space<vmem>>, vector<2x2xf32>,
    return
  }
  func.func @transform_0(%arg0: i32) -> (i32, i32) {
    %c0_i32 = arith.constant 0 : i32
    %c0_i32_0 = arith.constant 0 : i32
    %c0_i32_1 = arith.constant 0 : i32
    return %c0_i32, %c0_i32_0 : i32, i32
  }
  func.func @transform_1(%arg0: i32) -> (i32, i32) {
    %c0_i32 = arith.constant 0 : i32
    %c0_i32_0 = arith.constant 0 : i32
    %c0_i32_1 = arith.constant 0 : i32
    return %c0_i32, %c0_i32_0 : i32, i32
  }
  func.func @transform_2(%arg0: i32) -> (i32, i32) {
    %c0_i32 = arith.constant 0 : i32
    %c0_i32_0 = arith.constant 0 : i32
    %c0_i32_1 = arith.constant 0 : i32
    return %c0_i32, %c0_i32_0 : i32, i32
  }
  func.func @transform_3(%arg0: i32) -> (i32, i32, i32) {
    %c0_i32 = arith.constant 0 : i32
    %c0_i32_0 = arith.constant 0 : i32
    %c0_i32_1 = arith.constant 0 : i32
    %c0_i32_2 = arith.constant 0 : i32
    return %c0_i32, %c0_i32_0, %c0_i32_1 : i32, i32, i32
  }
  func.func @transform_4(%arg0: i32) -> (i32, i32, i32) {
    %c0_i32 = arith.constant 0 : i32
    %c0_i32_0 = arith.constant 0 : i32
    %c0_i32_1 = arith.constant 0 : i32
    %c0_i32_2 = arith.constant 0 : i32
    return %c0_i32, %c0_i32_0, %c0_i32_1 : i32, i32, i32
  }
  func.func @transform_5(%arg0: i32) -> (i32, i32, i32) {
    %c0_i32 = arith.constant 0 : i32
    %c0_i32_0 = arith.constant 0 : i32
    %c0_i32_1 = arith.constant 0 : i32
    %c0_i32_2 = arith.constant 0 : i32
    return %c0_i32, %c0_i32_0, %c0_i32_1 : i32, i32, i32
  }
  func.func @transform_6(%arg0: i32) -> (i32, i32) {
    %c0_i32 = arith.constant 0 : i32
    %c0_i32_0 = arith.constant 0 : i32
    %c0_i32_1 = arith.constant 0 : i32
    return %c0_i32, %c0_i32_0 : i32, i32
  }
}

</mosaic_0001>

<bundles_post_ra>
// kernel: bert_classifier_forward.1
= control target key start
LH: loop header
LB: loop body
LE: loop exit
PB: predicated region body
PF: predicated region fallthrough
CT: control target
= control target key end

     0   :  { %vm31_vm0 = vcmask 261120   ;;  %s2672_s0 = inlined_call_operand.vmem [shape: f32[16,32], index: 0, kind: input, shape index: {}]   ;;  %s2673_s1 = inlined_call_operand.vmem [shape: f32[2,8], index: 1, kind: input, shape index: {}]   ;;  %s2674_s2 = inlined_call_operand.vmem [shape: f32[40,128], index: 2, kind: input, shape index: {}]   ;;  %s2675_s3 = inlined_call_operand.vmem [shape: f32[2,32,192], index: 3, kind: input, shape index: {}]   ;;  %s2676_s4 = inlined_call_operand.vmem [shape: f32[2,64,32], index: 4, kind: input, shape index: {}]   ;;  %s2677_s5 = inlined_call_operand.vmem [shape: f32[2,8,128], index: 5, kind: input, shape index: {}]   ;;  %s2678_s6 = inlined_call_operand.hbm [shape: f32[2,2], index: 6, kind: output, shape index: {}]  }
   0x1   :  { %v29_v0 = vld [vmem:[%s2672_s0] sm:$0xff] }
   0x2   :  { %11 = vsyncpa [#allocation3], 0  ;;  %v32_v1 = vsel %vm31_vm0, %v29_v0, 0.0  ;;  %v30_v2 = vld [vmem:[%s2672_s0 + $0x8] sm:$0xff]  ;;  %v2099_v4 = vmov 32.0   ;;  %v2168_v21 = vld [vmem:[%s2675_s3 + $0x30] sm:$0xff] }
   0x3   :  { %33 = vadd.xlane.f32.xlu0 %v32_v1  ;;  %v35_v3 = vsel %vm31_vm0, %v30_v2, 0.0  ;;  %1978 = vrcp.f32 %v2099_v4  ;;  %130 = vmatpush.msra.mxu0 %v2168_v21  ;;  %v2174_v22 = vld [vmem:[%s2675_s3 + $0x20] sm:$0xff]  ;;  %v2180_v23 = vld [vmem:[%s2675_s3 + $0x10] sm:$0xff]  ;;  %s2100_s12 = smov 96   ;;  %s2101_s13 = smov 120   ;;  %vm144_vm8 = vcmask 64512  }
   0x4   :  { %v2186_v24 = vld [vmem:[%s2675_s3] sm:$0xff]  ;;  %v1938_v25 = vpack.i.bf16 %v2174_v22, %v2168_v21  ;;  %s2102_s14 = smov 88   ;;  %s2103_s15 = smov 104   ;;  %vm706_vm9 = vcmask 130048   ;;  %vm709_vm10 = vcmask 195584  }
   0x5   :  { %131 = vmatpush.msra.mxu0 %v2174_v22  ;;  %v1943_v26 = vpack.i.bf16 %v2186_v24, %v2180_v23  ;;  %v24_v38 = vld [vmem:[%s2674_s2] sm:$0xff]  ;;  %s2104_s16 = smov 112   ;;  %s2105_s17 = smov 72  }
   0x6   :  { %v83_v42 = vperm.slane %v24_v38, 0  ;;  %v86_v46 = vperm.slane %v24_v38, 1  ;;  %v2209_v56 = vld [vmem:[%s2677_s5] sm:$0xff]  ;;  %s2106_s18 = smov 80   ;;  %s2108_s21 = smov 64  }
   0x7   :  { %132 = vmatpush.msra.mxu0 %v2180_v23  ;;  %v111_v57 = vperm.slane %v2209_v56, 0  ;;  %s2109_s22 = smov 48   ;;  %s2110_s23 = smov 40  }
   0x8   :  { %s2111_s24 = smov 32   ;;  %s2112_s0 = smov 8  }
   0x9   :  { %v1979_v5 = vpop.eup %1978  ;;  %133 = vmatpush.msra.mxu0 %v2186_v24  ;;  %s2113_s25 = smov 16   ;;  %s2114_s26 = smov 24  }
   0xa   :  { %v39_v6 = vmul.f32 32.0, %v1979_v5  ;;  %vm43_vm1 = vweird.f32 %v1979_v5 }
   0xb   :  { %36 = vadd.xlane.f32.xlu0 %v35_v3 }
   0xc   :  { %v40_v7 = vsub.f32 1.0, %v39_v6 }
   0xe   :  { %v41_v8 = vmul.f32 %v1979_v5, %v40_v7 }
  0x10   :  { %v42_v9 = vadd.f32 %v1979_v5, %v41_v8 }
  0x12   :  { %v2159_v10 = vsel %vm43_vm1, %v1979_v5, %v42_v9 }
  0x76   :  { %v34_v11 = vpop.xlane.xlu0 %33 }
  0x77   :  { %v45_v12 = vmul.f32 %v2159_v10, %v34_v11 }
  0x79   :  { %v47_v13 = vsub.f32 %v29_v0, %v45_v12 }
  0x7b   :  { %v49_v14 = vmul.f32 %v47_v13, %v47_v13 }
  0x7d   :  { %v51_v15 = vsel %vm31_vm0, %v49_v14, 0.0 }
  0x7e   :  { %52 = vadd.xlane.f32.xlu1 %v51_v15  ;;  %v37_v16 = vpop.xlane.xlu0 %36 }
  0x7f   :  { %v46_v17 = vmul.f32 %v2159_v10, %v37_v16 }
  0x81   :  { %v48_v18 = vsub.f32 %v30_v2, %v46_v17 }
  0x83   :  { %v50_v19 = vmul.f32 %v48_v18, %v48_v18 }
  0x85   :  { %v54_v20 = vsel %vm31_vm0, %v50_v19, 0.0 }
  0x86   :  { %55 = vadd.xlane.f32.xlu1 %v54_v20 }
  0xf1   :  { %v53_v27 = vpop.xlane.xlu1 %52 }
  0xf2   :  { %v57_v28 = vmul.f32 %v53_v27, %v2159_v10 }
  0xf4   :  { %v59_v29 = vadd.f32 1e-12, %v57_v28 }
  0xf6   :  { %1980 = vrsqrt.f32 %v59_v29  ;;  %vm67_vm3 = vweird.f32 %v59_v29 }
  0xf9   :  { %v56_v30 = vpop.xlane.xlu1 %55 }
  0xfa   :  { %v58_v31 = vmul.f32 %v56_v30, %v2159_v10 }
  0xfc   :  { %v1981_v32 = vpop.eup %1980  ;;  %v60_v33 = vadd.f32 1e-12, %v58_v31 }
  0xfd   :  { %v62_v34 = vmul.f32 %v1981_v32, %v59_v29  ;;  %vm68_vm2 = vweird.f32 %v1981_v32 }
  0xfe   :  { %1982 = vrsqrt.f32 %v60_v33  ;;  %vm69_vm4 = vmor %vm67_vm3, %vm68_vm2  ;;  %vm77_vm6 = vweird.f32 %v60_v33  ;;  %vm859_vm2 = vcmask 523264  }
  0xff   :  { %v63_v35 = vmul.f32 %v1981_v32, %v62_v34 }
 0x101   :  { %v64_v36 = vmul.f32 0.5, %v63_v35 }
 0x103   :  { %v65_v37 = vsub.f32 1.5, %v64_v36 }
 0x104   :  { %v1983_v39 = vpop.eup %1982 }
 0x105   :  { %v66_v40 = vmul.f32 %v1981_v32, %v65_v37  ;;  %v72_v41 = vmul.f32 %v1983_v39, %v60_v33  ;;  %vm78_vm5 = vweird.f32 %v1983_v39 }
 0x106   :  { %vm79_vm7 = vmor %vm77_vm6, %vm78_vm5 }
 0x107   :  { %v70_v43 = vsel %vm69_vm4, %v1981_v32, %v66_v40  ;;  %v73_v44 = vmul.f32 %v1983_v39, %v72_v41 }
 0x108   :  { %v81_v45 = vmul.f32 %v70_v43, %v47_v13  ;;  %v89_v13 = vld [vmem:[%s2673_s1] sm:$0x3]  ;;  %s2107_s1 = smov 56  }
 0x109   :  { %v74_v47 = vmul.f32 0.5, %v73_v44  ;;  %v90_v14 = vsub.f32 1.0, %v89_v13 }
 0x10a   :  { %v84_v48 = vmul.f32 %v83_v42, %v81_v45 }
 0x10b   :  { %v75_v49 = vsub.f32 1.5, %v74_v47  ;;  %v91_v15 = vmul.f32 -1e+09, %v90_v14 }
 0x10c   :  { %v2198_v50 = vadd.f32 %v86_v46, %v84_v48 }
 0x10d   :  { %v76_v51 = vmul.f32 %v1983_v39, %v75_v49  ;;  %v2265_v16 = vperm.slane %v91_v15, 0  ;;  %v93_v20 = vrot.slane %v91_v15, 1 }
 0x10e   :  { %1829 = vmatmul.msk.f32.vlgmr.msra.gmra.mxu0 %vm31_vm0, %v2198_v50 }
 0x10f   :  { %v80_v52 = vsel %vm79_vm7, %v1983_v39, %v76_v51  ;;  %v2269_v28 = vperm.slane %v93_v20, 0 }
 0x110   :  { %v82_v53 = vmul.f32 %v80_v52, %v48_v18 }
 0x112   :  { %v85_v54 = vmul.f32 %v83_v42, %v82_v53 }
 0x114   :  { %v2202_v55 = vadd.f32 %v86_v46, %v85_v54 }
 0x116   :  { %1830 = vmatmul.msk.f32.gmra.mxu0 %vm31_vm0, %v2202_v55 }
 0x18b   :  { %v135_v58 = vpop.f32.mrf.mxu0 }
 0x18c   :  { %v2212_v59 = vadd.f32 %v135_v58, %v111_v57 }
 0x18e   :  { %142 = vrot.lane.b32.xlu2 %v2212_v59, %s2100_s12 }
 0x193   :  { %v138_v60 = vpop.f32.mrf.mxu0 }
 0x194   :  { %v2216_v61 = vadd.f32 %v138_v60, %v111_v57 }
 0x196   :  { %306 = vrot.lane.b32.xlu1 %v2216_v61, %s2101_s13  ;;  %308 = vrot.lane.b32.xlu0 %v2216_v61, %s2102_s14 }
 0x197   :  { %170 = vrot.lane.b32.xlu2 %v2216_v61, %s2100_s12 }
 0x19e   :  { %546 = vrot.lane.b32.xlu1 %v2212_v59, %s2103_s15  ;;  %412 = vrot.lane.b32.xlu0 %v2212_v59, %s2104_s16 }
 0x19f   :  { %280 = vrot.lane.b32.xlu2 %v2212_v59, %s2102_s14 }
 0x1a6   :  { %576 = vrot.lane.b32.xlu1 %v2216_v61, %s2105_s17  ;;  %442 = vrot.lane.b32.xlu0 %v2216_v61, %s2106_s18 }
 0x1a7   :  { %414 = vrot.lane.b32.xlu2 %v2212_v59, %s2106_s18 }
 0x1ae   :  { %574 = vrot.lane.b32.xlu0 %v2216_v61, %s2103_s15 }
 0x1af   :  { %278 = vrot.lane.b32.xlu2 %v2212_v59, %s2101_s13 }
 0x1b7   :  { %548 = vrot.lane.b32.xlu2 %v2212_v59, %s2105_s17 }
 0x1bf   :  { %440 = vrot.lane.b32.xlu2 %v2216_v61, %s2104_s16 }
 0x1e8   :  { %v143_v62 = vpop.permute.xlu2 %142 }
 0x1e9   :  { %1831 = vmatpush.xpose.msk.msra.mxu2 %vm144_vm8, %v143_v62  ;;  %v1933_v62 = vpack.i.bf16 %v2216_v61, %v2212_v59 }
 0x1ec   :  { %1832 = vmatmul.msk.f32.vlgmr.msra.gmra.mxu2 %vm144_vm8, %v2212_v59 }
 0x1f1   :  { %v171_v63 = vpop.permute.xlu2 %170 }
 0x1f2   :  { %1833 = vmatpush.xpose.msk.msrb.mxu2 %vm144_vm8, %v171_v63 }
 0x1f5   :  { %1834 = vmatmul.msk.f32.vlgmr.msrb.gmra.mxu2 %vm144_vm8, %v2216_v61 }
 0x1f9   :  { %v281_v0 = vpop.permute.xlu2 %280 }
 0x1fa   :  { %1837 = vmatpush.xpose.msk.msra.mxu1 %vm144_vm8, %v281_v0 }
 0x201   :  { %v415_v1 = vpop.permute.xlu2 %414 }
 0x208   :  { %v307_v2 = vpop.permute.xlu1 %306  ;;  %v309_v3 = vpop.permute.xlu0 %308 }
 0x209   :  { %v279_v4 = vpop.permute.xlu2 %278  ;;  %1839 = vmatpush.xpose.msk.msra.mxu2 %vm144_vm8, %v309_v3 }
 0x20a   :  { %1838 = vmatmul.msk.f32.vlgmr.msra.gmra.mxu1 %vm144_vm8, %v279_v4 }
 0x20c   :  { %1840 = vmatmul.msk.f32.vlgmr.msra.gmra.mxu2 %vm144_vm8, %v307_v2 }
 0x20d   :  { %1843 = vmatpush.xpose.msk.msrb.mxu2 %vm144_vm8, %v415_v1 }
 0x210   :  { %v547_v5 = vpop.permute.xlu1 %546  ;;  %v413_v6 = vpop.permute.xlu0 %412 }
 0x211   :  { %v549_v7 = vpop.permute.xlu2 %548 }
 0x212   :  { %1849 = vmatpush.xpose.msk.msra.mxu2 %vm144_vm8, %v549_v7 }
 0x214   :  { %1844 = vmatmul.msk.f32.vlgmr.msrb.gmra.mxu2 %vm144_vm8, %v413_v6 }
 0x218   :  { %v577_v8 = vpop.permute.xlu1 %576  ;;  %v443_v9 = vpop.permute.xlu0 %442 }
 0x219   :  { %1845 = vmatpush.xpose.msk.msrb.mxu0 %vm144_vm8, %v443_v9  ;;  %v441_v11 = vpop.permute.xlu2 %440 }
 0x21c   :  { %1846 = vmatmul.msk.f32.vlgmr.msrb.gmra.mxu0 %vm144_vm8, %v441_v11  ;;  %1850 = vmatmul.msk.f32.vlgmr.msra.gmra.mxu2 %vm144_vm8, %v547_v5 }
 0x21d   :  { %1851 = vmatpush.xpose.msk.msra.mxu0 %vm144_vm8, %v577_v8 }
 0x220   :  { %v575_v12 = vpop.permute.xlu0 %574 }
 0x224   :  { %1852 = vmatmul.msk.f32.vlgmr.msra.gmra.mxu0 %vm144_vm8, %v575_v12 }
 0x26f   :  { %v166_v17 = vpop.f32.mrf.mxu2 }
 0x270   :  { %v196_v18 = vmul.f32 0.35355338, %v166_v17 }
 0x272   :  { %v202_v19 = vadd.f32 %v2265_v16, %v196_v18 }
 0x274   :  { %v204_v27 = vsel %vm144_vm8, %v202_v19, -inf }
 0x275   :  { %205 = vmax.xlane.f32.xlu2 %v204_v27 }
 0x278   :  { %v193_v29 = vpop.f32.mrf.mxu2 }
 0x279   :  { %v197_v30 = vmul.f32 0.35355338, %v193_v29 }
 0x27b   :  { %v203_v31 = vadd.f32 %v2269_v28, %v197_v30 }
 0x27d   :  { %v207_v32 = vsel %vm144_vm8, %v203_v31, -inf }
 0x27e   :  { %208 = vmax.xlane.f32.xlu1 %v207_v32 }
 0x287   :  { %v303_v33 = vpop.f32.mrf.mxu1 }
 0x288   :  { %v334_v34 = vmul.f32 0.35355338, %v303_v33 }
 0x28a   :  { %v336_v35 = vadd.f32 %v334_v34, %v2265_v16 }
 0x28c   :  { %v338_v36 = vsel %vm144_vm8, %v336_v35, -inf }
 0x28d   :  { %339 = vmax.xlane.f32.xlu0 %v338_v36 }
 0x28f   :  { %v331_v37 = vpop.f32.mrf.mxu2 }
 0x290   :  { %v335_v53 = vmul.f32 0.35355338, %v331_v37 }
 0x292   :  { %v337_v58 = vadd.f32 %v335_v53, %v2269_v28 }
 0x294   :  { %v341_v60 = vsel %vm144_vm8, %v337_v58, -inf }
 0x297   :  { %v437_v38 = vpop.f32.mrf.mxu2 }
 0x298   :  { %v468_v42 = vmul.f32 0.35355338, %v437_v38 }
 0x299   :  { %v465_v39 = vpop.f32.mrf.mxu0 }
 0x29a   :  { %v469_v40 = vmul.f32 0.35355338, %v465_v39  ;;  %v470_v49 = vadd.f32 %v468_v42, %v2265_v16 }
 0x29c   :  { %v471_v41 = vadd.f32 %v469_v40, %v2269_v28  ;;  %v472_v57 = vsel %vm144_vm8, %v470_v49, -inf }
 0x29e   :  { %v475_v43 = vsel %vm144_vm8, %v471_v41, -inf }
 0x29f   :  { %v571_v44 = vpop.f32.mrf.mxu2  ;;  %476 = vmax.xlane.f32.xlu2 %v475_v43 }
 0x2a0   :  { %v602_v45 = vmul.f32 0.35355338, %v571_v44 }
 0x2a1   :  { %v599_v46 = vpop.f32.mrf.mxu0 }
 0x2a2   :  { %v603_v47 = vmul.f32 0.35355338, %v599_v46  ;;  %v2278_v48 = vadd.f32 %v602_v45, %v2265_v16 }
 0x2a4   :  { %v606_v51 = vsel %vm144_vm8, %v2278_v48, -inf  ;;  %v605_v52 = vadd.f32 %v603_v47, %v2269_v28 }
 0x2a5   :  { %607 = vmax.xlane.f32.xlu0 %v606_v51 }
 0x2a6   :  { %v609_v54 = vsel %vm144_vm8, %v605_v52, -inf }
 0x2a7   :  { %610 = vmax.xlane.f32.xlu1 %v609_v54  ;;  %473 = vmax.xlane.f32.xlu2 %v472_v57 }
 0x2af   :  { %342 = vmax.xlane.f32.xlu1 %v341_v60 }
 0x2b9   :  { %1934 = vrot.lane.b32.xlu0 %v1933_v62, %s2107_s1 }
 0x2c8   :  { %1929 = vrot.lane.b32.xlu1 %v1933_v62, %s2108_s21 }
 0x2d0   :  { %494 = vrot.lane.b32.xlu1 %v2212_v59, %s2109_s22 }
 0x2e8   :  { %v206_v63 = vpop.xlane.xlu2 %205 }
 0x2e9   :  { %v210_v2 = vsub.f32 %v202_v19, %v206_v63 }
 0x2eb   :  { %v212_v4 = vmul.f32 1.442695, %v210_v2 }
 0x2f1   :  { %v209_v8 = vpop.xlane.xlu1 %208 }
 0x2f2   :  { %v211_v13 = vsub.f32 %v203_v31, %v209_v8 }
 0x2f4   :  { %v214_v15 = vmul.f32 1.442695, %v211_v13 }
 0x300   :  { %v340_v0 = vpop.xlane.xlu0 %339 }
 0x301   :  { %v344_v1 = vsub.f32 %v336_v35, %v340_v0 }
 0x303   :  { %v346_v3 = vmul.f32 1.442695, %v344_v1 }
 0x305   :  { %1984 = vpow2.f32 %v346_v3 }
 0x306   :  { %1986 = vpow2.f32 %v212_v4 }
 0x30b   :  { %v2294_v5 = vpop.eup %1984 }
 0x30c   :  { %v350_v6 = vsel %vm144_vm8, %v2294_v5, 0.0  ;;  %v1987_v7 = vpop.eup %1986 }
 0x30d   :  { %351 = vadd.xlane.f32.xlu0 %v350_v6  ;;  %v216_v12 = vsel %vm144_vm8, %v1987_v7, 0.0 }
 0x312   :  { %v477_v9 = vpop.xlane.xlu2 %476 }
 0x313   :  { %v479_v11 = vsub.f32 %v471_v41, %v477_v9 }
 0x315   :  { %v482_v14 = vmul.f32 1.442695, %v479_v11  ;;  %217 = vadd.xlane.f32.xlu0 %v216_v12 }
 0x317   :  { %1988 = vpow2.f32 %v482_v14 }
 0x318   :  { %1990 = vpow2.f32 %v214_v15  ;;  %v608_v33 = vpop.xlane.xlu0 %607 }
 0x319   :  { %v612_v43 = vsub.f32 %v2278_v48, %v608_v33 }
 0x31a   :  { %v611_v17 = vpop.xlane.xlu1 %610  ;;  %v474_v29 = vpop.xlane.xlu2 %473 }
 0x31b   :  { %v613_v18 = vsub.f32 %v605_v52, %v611_v17  ;;  %v478_v35 = vsub.f32 %v470_v49, %v474_v29  ;;  %v614_v45 = vmul.f32 1.442695, %v612_v43 }
 0x31d   :  { %v2299_v19 = vpop.eup %1988  ;;  %v616_v20 = vmul.f32 1.442695, %v613_v18  ;;  %v480_v39 = vmul.f32 1.442695, %v478_v35 }
 0x31e   :  { %v487_v27 = vsel %vm144_vm8, %v2299_v19, 0.0  ;;  %v1991_v32 = vpop.eup %1990 }
 0x31f   :  { %1992 = vpow2.f32 %v616_v20  ;;  %488 = vadd.xlane.f32.xlu2 %v487_v27  ;;  %v219_v38 = vsel %vm144_vm8, %v1991_v32, 0.0 }
 0x322   :  { %v343_v30 = vpop.xlane.xlu1 %342 }
 0x323   :  { %v345_v31 = vsub.f32 %v337_v58, %v343_v30 }
 0x325   :  { %v2303_v34 = vpop.eup %1992  ;;  %v348_v36 = vmul.f32 1.442695, %v345_v31 }
 0x326   :  { %v621_v37 = vsel %vm144_vm8, %v2303_v34, 0.0 }
 0x327   :  { %1994 = vpow2.f32 %v348_v36  ;;  %622 = vadd.xlane.f32.xlu1 %v621_v37  ;;  %220 = vadd.xlane.f32.xlu2 %v219_v38 }
 0x328   :  { %1996 = vpow2.f32 %v480_v39 }
 0x329   :  { %628 = vrot.lane.b32.xlu0 %v2212_v59, %s2110_s23  ;;  %1998 = vpow2.f32 %v614_v45 }
 0x32b   :  { %v1935_v40 = vpop.permute.xlu0 %1934 }
 0x32c   :  { %v1937_v41 = vunpack.i.h.bf16 %v1935_v40  ;;  %v1936_v60 = vunpack.i.l.bf16 %v1935_v40 }
 0x32d   :  { %v1995_v42 = vpop.eup %1994 }
 0x32e   :  { %407 = vmatpush.msrb.mxu1 %v1937_v41  ;;  %v353_v44 = vsel %vm144_vm8, %v1995_v42, 0.0  ;;  %v1997_v46 = vpop.eup %1996 }
 0x32f   :  { %354 = vadd.xlane.f32.xlu2 %v353_v44  ;;  %v484_v47 = vsel %vm144_vm8, %v1997_v46, 0.0  ;;  %v1999_v49 = vpop.eup %1998 }
 0x330   :  { %v618_v48 = vsel %vm144_vm8, %v1999_v49, 0.0 }
 0x331   :  { %654 = vrot.lane.b32.xlu0 %v2216_v61, %s2110_s23 }
 0x337   :  { %485 = vadd.xlane.f32.xlu2 %v484_v47 }
 0x339   :  { %1939 = vrot.lane.b32.xlu0 %v1938_v25, %s2111_s24 }
 0x33a   :  { %v1930_v59 = vpop.permute.xlu1 %1929 }
 0x33b   :  { %v1931_v51 = vunpack.i.l.bf16 %v1930_v59  ;;  %v1932_v52 = vunpack.i.h.bf16 %v1930_v59 }
 0x33d   :  { %247 = vmatpush.msra.mxu3 %v1931_v51  ;;  %v712_v51 = vperm.slane %v2209_v56, 1 }
 0x33f   :  { %273 = vmatpush.msrb.mxu3 %v1932_v52  ;;  %619 = vadd.xlane.f32.xlu2 %v618_v48 }
 0x342   :  { %v495_v3 = vpop.permute.xlu1 %494 }
 0x357   :  { %520 = vrot.lane.b32.xlu2 %v2216_v61, %s2109_s22 }
 0x35f   :  { %1944 = vrot.lane.b32.xlu2 %v1943_v26, %s2111_s24 }
 0x380   :  { %v352_v53 = vpop.xlane.xlu0 %351 }
 0x388   :  { %v218_v54 = vpop.xlane.xlu0 %217 }
 0x389   :  { %2000 = vrcp.f32 %v218_v54 }
 0x38f   :  { %v2001_v57 = vpop.eup %2000 }
 0x390   :  { %v224_v58 = vmul.f32 %v2001_v57, %v1987_v7 }
 0x392   :  { %1835 = vmatmul.msk.f32.vlgmr.msra.gmra.mxu3 %vm144_vm8, %v224_v58  ;;  %v489_v62 = vpop.xlane.xlu2 %488 }
 0x393   :  { %381 = vmatpush.msra.mxu3 %v1936_v60 }
 0x39a   :  { %v221_v63 = vpop.xlane.xlu2 %220  ;;  %v623_v23 = vpop.xlane.xlu1 %622 }
 0x39b   :  { %2002 = vrcp.f32 %v221_v63  ;;  %v629_v9 = vpop.permute.xlu0 %628 }
 0x39c   :  { %2004 = vrcp.f32 %v352_v53 }
 0x3a1   :  { %v2003_v0 = vpop.eup %2002 }
 0x3a2   :  { %v355_v1 = vpop.xlane.xlu2 %354  ;;  %v225_v2 = vmul.f32 %v2003_v0, %v1991_v32  ;;  %v2005_v61 = vpop.eup %2004 }
 0x3a3   :  { %2006 = vrcp.f32 %v355_v1  ;;  %v358_v8 = vmul.f32 %v2005_v61, %v2294_v5  ;;  %v655_v13 = vpop.permute.xlu0 %654 }
 0x3a4   :  { %1836 = vmatmul.msk.f32.vlgmr.msrb.gmra.mxu3 %vm144_vm8, %v225_v2 }
 0x3a5   :  { %515 = vmatpush.msrb.mxu3 %v495_v3 }
 0x3a9   :  { %v2007_v4 = vpop.eup %2006 }
 0x3aa   :  { %v486_v6 = vpop.xlane.xlu2 %485  ;;  %v359_v7 = vmul.f32 %v2007_v4, %v1995_v42 }
 0x3ab   :  { %2008 = vrcp.f32 %v486_v6  ;;  %v1940_v20 = vpop.permute.xlu0 %1939 }
 0x3ac   :  { %1842 = vmatmul.msk.f32.vlgmr.msrb.gmra.mxu1 %vm144_vm8, %v359_v7  ;;  %1841 = vmatmul.msk.f32.vlgmr.msra.gmra.mxu3 %vm144_vm8, %v358_v8  ;;  %2010 = vrcp.f32 %v489_v62  ;;  %v1942_v27 = vunpack.i.h.bf16 %v1940_v20  ;;  %v1941_v29 = vunpack.i.l.bf16 %v1940_v20  ;;  %v99_v8 = vld [vmem:[%s2675_s3 + $0x28] sm:$0xff]  ;;  %v804_v20 = vperm.slane %v2209_v56, 2 }
 0x3ad   :  { %649 = vmatpush.msra.mxu3 %v629_v9  ;;  %v97_v9 = vld [vmem:[%s2675_s3 + $0x18] sm:$0xff] }
 0x3ae   :  { %747 = vmatpush.msrb.mxu2 %v1941_v29 }
 0x3b0   :  { %748 = vmatpush.msrb.mxu2 %v1942_v27 }
 0x3b1   :  { %v2009_v11 = vpop.eup %2008 }
 0x3b2   :  { %v492_v21 = vmul.f32 %v2009_v11, %v1997_v46  ;;  %v620_v22 = vpop.xlane.xlu2 %619  ;;  %v2011_v24 = vpop.eup %2010  ;;  %v95_v11 = vld [vmem:[%s2675_s3 + $0x8] sm:$0xff] }
 0x3b3   :  { %2012 = vrcp.f32 %v620_v22  ;;  %v493_v26 = vmul.f32 %v2011_v24, %v2299_v19 }
 0x3b4   :  { %1847 = vmatmul.msk.f32.vlgmr.msrb.gmra.mxu3 %vm144_vm8, %v492_v21  ;;  %2014 = vrcp.f32 %v623_v23 }
 0x3b9   :  { %v2013_v25 = vpop.eup %2012 }
 0x3ba   :  { %v626_v5 = vmul.f32 %v2013_v25, %v1999_v49  ;;  %v521_v12 = vpop.permute.xlu2 %520  ;;  %v2015_v14 = vpop.eup %2014 }
 0x3bb   :  { %541 = vmatpush.msra.mxu1 %v521_v12  ;;  %v627_v15 = vmul.f32 %v2015_v14, %v2303_v34 }
 0x3bc   :  { %1848 = vmatmul.msk.f32.vlgmr.msra.gmra.mxu1 %vm144_vm8, %v493_v26  ;;  %1853 = vmatmul.msk.f32.vlgmr.msra.gmra.mxu3 %vm144_vm8, %v626_v5 }
 0x3bd   :  { %675 = vmatpush.msrb.mxu1 %v655_v13 }
 0x3c2   :  { %v1945_v19 = vpop.permute.xlu2 %1944 }
 0x3c3   :  { %v1946_v30 = vunpack.i.l.bf16 %v1945_v19  ;;  %v1947_v32 = vunpack.i.h.bf16 %v1945_v19 }
 0x3c4   :  { %1854 = vmatmul.msk.f32.vlgmr.msrb.gmra.mxu1 %vm144_vm8, %v627_v15 }
 0x3c5   :  { %749 = vmatpush.msrb.mxu2 %v1946_v30 }
 0x3c7   :  { %750 = vmatpush.msrb.mxu2 %v1947_v32  ;;  %v807_v32 = vperm.slane %v2209_v56, 3 }
 0x415   :  { %v249_v17 = vpop.f32.mrf.mxu3 }
 0x427   :  { %v275_v18 = vpop.f32.mrf.mxu3 }
 0x429   :  { %v409_v31 = vpop.f32.mrf.mxu1 }
 0x42f   :  { %v383_v33 = vpop.f32.mrf.mxu3 }
 0x430   :  { %682 = vrot.lane.b32.xlu0 %v383_v33, %s2112_s0 }
 0x437   :  { %v517_v34 = vpop.f32.mrf.mxu3 }
 0x438   :  { %690 = vrot.lane.b32.xlu0 %v517_v34, %s2113_s25 }
 0x439   :  { %v543_v35 = vpop.f32.mrf.mxu1 }
 0x43a   :  { %692 = vrot.lane.b32.xlu1 %v543_v35, %s2113_s25 }
 0x43f   :  { %v651_v36 = vpop.f32.mrf.mxu3 }
 0x440   :  { %684 = vrot.lane.b32.xlu0 %v409_v31, %s2112_s0  ;;  %698 = vrot.lane.b32.xlu2 %v651_v36, %s2114_s26 }
 0x441   :  { %v677_v37 = vpop.f32.mrf.mxu1 }
 0x448   :  { %700 = vrot.lane.b32.xlu2 %v677_v37, %s2114_s26 }
 0x49a   :  { %v699_v39 = vpop.permute.xlu2 %698 }
 0x4a2   :  { %v683_v38 = vpop.permute.xlu0 %682  ;;  %v701_v47 = vpop.permute.xlu2 %700 }
 0x4a3   :  { %v704_v40 = vsel %vm144_vm8, %v249_v17, %v683_v38 }
 0x4aa   :  { %v691_v41 = vpop.permute.xlu0 %690 }
 0x4ab   :  { %v707_v42 = vsel %vm706_vm9, %v704_v40, %v691_v41  ;;  %v109_v41 = vld [vmem:[%s2676_s4 + $0x38] sm:$0xff] }
 0x4ac   :  { %v710_v43 = vsel %vm709_vm10, %v707_v42, %v699_v39  ;;  %v693_v45 = vpop.permute.xlu1 %692  ;;  %874 = vmatpush.msrb.mxu3 %v109_v41  ;;  %v108_v42 = vld [vmem:[%s2676_s4 + $0x30] sm:$0xff] }
 0x4ad   :  { %1855 = vmatmul.msk.f32.vlgmr.msrb.gmra.mxu2 %vm31_vm0, %v710_v43  ;;  %v107_v43 = vld [vmem:[%s2676_s4 + $0x28] sm:$0xff] }
 0x4ae   :  { %875 = vmatpush.msrb.mxu3 %v108_v42 }
 0x4b0   :  { %876 = vmatpush.msrb.mxu3 %v107_v43 }
 0x4b2   :  { %v685_v44 = vpop.permute.xlu0 %684 }
 0x4b3   :  { %v705_v46 = vsel %vm144_vm8, %v275_v18, %v685_v44  ;;  %v106_v44 = vld [vmem:[%s2676_s4 + $0x20] sm:$0xff] }
 0x4b4   :  { %v708_v59 = vsel %vm706_vm9, %v705_v46, %v693_v45  ;;  %v105_v45 = vld [vmem:[%s2676_s4 + $0x18] sm:$0xff]  ;;  %877 = vmatpush.msrb.mxu3 %v106_v44  ;;  %v104_v46 = vld [vmem:[%s2676_s4 + $0x10] sm:$0xff] }
 0x4b5   :  { %v711_v49 = vsel %vm709_vm10, %v708_v59, %v701_v47  ;;  %v103_v47 = vld [vmem:[%s2676_s4 + $0x8] sm:$0xff]  ;;  %v102_v59 = vld [vmem:[%s2676_s4] sm:$0xff] }
 0x4b6   :  { %1856 = vmatmul.msk.f32.gmra.mxu2 %vm31_vm0, %v711_v49  ;;  %878 = vmatpush.msrb.mxu3 %v105_v45  ;;  %v810_v49 = vperm.slane %v2209_v56, 4 }
 0x4b8   :  { %879 = vmatpush.msrb.mxu3 %v104_v46 }
 0x4ba   :  { %880 = vmatpush.msrb.mxu3 %v103_v47 }
 0x4bc   :  { %881 = vmatpush.msrb.mxu3 %v102_v59 }
 0x530   :  { %v752_v52 = vpop.f32.mrf.mxu2 }
 0x531   :  { %v753_v48 = vadd.f32 %v752_v52, %v712_v51 }
 0x533   :  { %v758_v53 = vadd.f32 %v753_v48, %v2198_v50 }
 0x535   :  { %v760_v54 = vsel %vm31_vm0, %v758_v53, 0.0 }
 0x536   :  { %761 = vadd.xlane.f32.xlu0 %v760_v54 }
 0x539   :  { %v755_v57 = vpop.f32.mrf.mxu2 }
 0x53a   :  { %v756_v58 = vadd.f32 %v755_v57, %v712_v51 }
 0x53c   :  { %v759_v60 = vadd.f32 %v756_v58, %v2202_v55  ;;  %v101_v55 = vld [vmem:[%s2675_s3 + $0x38] sm:$0xff] }
 0x53d   :  { %829 = vmatpush.msrb.mxu0 %v101_v55 }
 0x53e   :  { %v763_v62 = vsel %vm31_vm0, %v759_v60, 0.0 }
 0x53f   :  { %764 = vadd.xlane.f32.xlu2 %v763_v62  ;;  %830 = vmatpush.msrb.mxu0 %v99_v8 }
 0x541   :  { %831 = vmatpush.msrb.mxu0 %v97_v9 }
 0x543   :  { %832 = vmatpush.msrb.mxu0 %v95_v11  ;;  %v858_v11 = vperm.slane %v2209_v56, 5 }
 0x5a9   :  { %v762_v63 = vpop.xlane.xlu0 %761 }
 0x5aa   :  { %v766_v0 = vmul.f32 %v762_v63, %v2159_v10 }
 0x5ac   :  { %v768_v1 = vsub.f32 %v758_v53, %v766_v0 }
 0x5ae   :  { %v770_v2 = vmul.f32 %v768_v1, %v768_v1 }
 0x5b0   :  { %v772_v3 = vsel %vm31_vm0, %v770_v2, 0.0 }
 0x5b1   :  { %773 = vadd.xlane.f32.xlu1 %v772_v3 }
 0x5b2   :  { %v765_v61 = vpop.xlane.xlu2 %764 }
 0x5b3   :  { %v767_v50 = vmul.f32 %v765_v61, %v2159_v10 }
 0x5b5   :  { %v769_v4 = vsub.f32 %v759_v60, %v767_v50 }
 0x5b7   :  { %v771_v6 = vmul.f32 %v769_v4, %v769_v4 }
 0x5b9   :  { %v775_v7 = vsel %vm31_vm0, %v771_v6, 0.0 }
 0x5ba   :  { %776 = vadd.xlane.f32.xlu0 %v775_v7 }
 0x624   :  { %v774_v21 = vpop.xlane.xlu1 %773 }
 0x625   :  { %v778_v22 = vmul.f32 %v774_v21, %v2159_v10 }
 0x627   :  { %v780_v23 = vadd.f32 1e-12, %v778_v22 }
 0x629   :  { %2016 = vrsqrt.f32 %v780_v23  ;;  %vm788_vm12 = vweird.f32 %v780_v23 }
 0x62d   :  { %v777_v24 = vpop.xlane.xlu0 %776 }
 0x62e   :  { %v779_v25 = vmul.f32 %v777_v24, %v2159_v10 }
 0x62f   :  { %v2017_v26 = vpop.eup %2016 }
 0x630   :  { %v783_v5 = vmul.f32 %v2017_v26, %v780_v23  ;;  %v781_v12 = vadd.f32 1e-12, %v779_v25  ;;  %vm789_vm11 = vweird.f32 %v2017_v26 }
 0x631   :  { %vm790_vm13 = vmor %vm788_vm12, %vm789_vm11 }
 0x632   :  { %v784_v13 = vmul.f32 %v2017_v26, %v783_v5  ;;  %2018 = vrsqrt.f32 %v781_v12  ;;  %vm798_vm15 = vweird.f32 %v781_v12 }
 0x634   :  { %v785_v14 = vmul.f32 0.5, %v784_v13 }
 0x636   :  { %v786_v15 = vsub.f32 1.5, %v785_v14 }
 0x638   :  { %v2019_v17 = vpop.eup %2018  ;;  %v787_v18 = vmul.f32 %v2017_v26, %v786_v15 }
 0x639   :  { %v793_v27 = vmul.f32 %v2019_v17, %v781_v12  ;;  %vm799_vm14 = vweird.f32 %v2019_v17 }
 0x63a   :  { %v791_v29 = vsel %vm790_vm13, %v2017_v26, %v787_v18  ;;  %vm800_vm1 = vmor %vm798_vm15, %vm799_vm14 }
 0x63b   :  { %v802_v19 = vmul.f32 %v791_v29, %v768_v1  ;;  %v794_v30 = vmul.f32 %v2019_v17, %v793_v27 }
 0x63d   :  { %v805_v33 = vmul.f32 %v804_v20, %v802_v19  ;;  %v795_v31 = vmul.f32 0.5, %v794_v30 }
 0x63f   :  { %v796_v34 = vsub.f32 1.5, %v795_v31  ;;  %v808_v35 = vadd.f32 %v807_v32, %v805_v33  ;;  %v2421_v33 = vld [vmem:[%s2675_s3 + $0x60] sm:$0xff]  ;;  %v2427_v31 = vld [vmem:[%s2675_s3 + $0x50] sm:$0xff] }
 0x641   :  { %v797_v36 = vmul.f32 %v2019_v17, %v796_v34  ;;  %1857 = vmatmul.msk.f32.vlgmr.msrb.gmra.mxu0 %vm31_vm0, %v808_v35  ;;  %v2433_v34 = vld [vmem:[%s2675_s3 + $0x40] sm:$0xff] }
 0x643   :  { %v801_v37 = vsel %vm800_vm1, %v2019_v17, %v797_v36  ;;  %v1973_v36 = vpack.i.bf16 %v2433_v34, %v2427_v31 }
 0x644   :  { %v803_v38 = vmul.f32 %v801_v37, %v769_v4 }
 0x646   :  { %v806_v39 = vmul.f32 %v804_v20, %v803_v38 }
 0x648   :  { %v809_v40 = vadd.f32 %v807_v32, %v806_v39  ;;  %v2415_v32 = vld [vmem:[%s2675_s3 + $0x70] sm:$0xff] }
 0x649   :  { %980 = vmatpush.msra.mxu1 %v2415_v32 }
 0x64a   :  { %1858 = vmatmul.msk.f32.gmra.mxu0 %vm31_vm0, %v809_v40 }
 0x64b   :  { %981 = vmatpush.msra.mxu1 %v2421_v33 }
 0x64d   :  { %982 = vmatpush.msra.mxu1 %v2427_v31 }
 0x64f   :  { %983 = vmatpush.msra.mxu1 %v2433_v34 }
 0x6be   :  { %v834_v51 = vpop.f32.mrf.mxu0 }
 0x6bf   :  { %v835_v52 = vadd.f32 %v834_v51, %v810_v49  ;;  %v935_v51 = vperm.slane %v2209_v56, 6 }
 0x6c1   :  { %v842_v48 = vmul.f32 0.044715, %v835_v52  ;;  %v840_v61 = vmul.f32 0.5, %v835_v52 }
 0x6c3   :  { %v844_v53 = vmul.f32 %v842_v48, %v835_v52 }
 0x6c5   :  { %v846_v54 = vmul.f32 %v844_v53, %v835_v52 }
 0x6c7   :  { %v848_v57 = vadd.f32 %v846_v54, %v835_v52  ;;  %v837_v58 = vpop.f32.mrf.mxu0 }
 0x6c8   :  { %v838_v60 = vadd.f32 %v837_v58, %v810_v49 }
 0x6c9   :  { %v850_v62 = vmul.f32 0.7978846, %v848_v57  ;;  %v938_v57 = vperm.slane %v2209_v56, 7  ;;  %v2455_v56 = vld [vmem:[%s2677_s5 + $0x8] sm:$0xff] }
 0x6ca   :  { %v843_v63 = vmul.f32 0.044715, %v838_v60  ;;  %v841_v55 = vmul.f32 0.5, %v838_v60 }
 0x6cb   :  { %2020 = vtanh.f32 %v850_v62 }
 0x6cc   :  { %v845_v0 = vmul.f32 %v843_v63, %v838_v60 }
 0x6ce   :  { %v847_v1 = vmul.f32 %v845_v0, %v838_v60 }
 0x6d0   :  { %v849_v2 = vadd.f32 %v847_v1, %v838_v60 }
 0x6d1   :  { %v2021_v3 = vpop.eup %2020 }
 0x6d2   :  { %v854_v50 = vadd.f32 1.0, %v2021_v3  ;;  %v851_v4 = vmul.f32 0.7978846, %v849_v2 }
 0x6d4   :  { %v856_v6 = vmul.f32 %v854_v50, %v840_v61  ;;  %2022 = vtanh.f32 %v851_v4  ;;  %v961_v50 = vperm.slane %v2455_v56, 0 }
 0x6d6   :  { %1859 = vmatmul.msk.f32.vlgmr.msrb.gmra.mxu3 %vm859_vm2, %v856_v6 }
 0x6da   :  { %v2023_v7 = vpop.eup %2022 }
 0x6db   :  { %v855_v8 = vadd.f32 1.0, %v2023_v7 }
 0x6dd   :  { %v857_v9 = vmul.f32 %v855_v8, %v841_v55 }
 0x6df   :  { %1860 = vmatmul.msk.f32.gmra.mxu3 %vm859_vm2, %v857_v9 }
 0x759   :  { %v883_v21 = vpop.f32.mrf.mxu3 }
 0x75a   :  { %v884_v22 = vadd.f32 %v883_v21, %v858_v11 }
 0x75c   :  { %v889_v23 = vadd.f32 %v884_v22, %v808_v35  ;;  %v1968_v35 = vpack.i.bf16 %v2421_v33, %v2415_v32 }
 0x75e   :  { %v891_v24 = vsel %vm31_vm0, %v889_v23, 0.0 }
 0x75f   :  { %892 = vadd.xlane.f32.xlu2 %v891_v24 }
 0x762   :  { %v886_v25 = vpop.f32.mrf.mxu3 }
 0x763   :  { %v887_v26 = vadd.f32 %v886_v25, %v858_v11 }
 0x765   :  { %v890_v5 = vadd.f32 %v887_v26, %v809_v40 }
 0x767   :  { %v894_v12 = vsel %vm31_vm0, %v890_v5, 0.0 }
 0x768   :  { %895 = vadd.xlane.f32.xlu0 %v894_v12 }
 0x7d2   :  { %v893_v13 = vpop.xlane.xlu2 %892 }
 0x7d3   :  { %v897_v14 = vmul.f32 %v893_v13, %v2159_v10 }
 0x7d5   :  { %v899_v15 = vsub.f32 %v889_v23, %v897_v14 }
 0x7d7   :  { %v901_v17 = vmul.f32 %v899_v15, %v899_v15 }
 0x7d9   :  { %v903_v18 = vsel %vm31_vm0, %v901_v17, 0.0 }
 0x7da   :  { %904 = vadd.xlane.f32.xlu2 %v903_v18 }
 0x7db   :  { %v896_v20 = vpop.xlane.xlu0 %895 }
 0x7dc   :  { %v898_v27 = vmul.f32 %v896_v20, %v2159_v10 }
 0x7de   :  { %v900_v29 = vsub.f32 %v890_v5, %v898_v27 }
 0x7e0   :  { %v902_v19 = vmul.f32 %v900_v29, %v900_v29 }
 0x7e2   :  { %v906_v30 = vsel %vm31_vm0, %v902_v19, 0.0 }
 0x7e3   :  { %907 = vadd.xlane.f32.xlu0 %v906_v30 }
 0x84d   :  { %v905_v37 = vpop.xlane.xlu2 %904 }
 0x84e   :  { %v909_v38 = vmul.f32 %v905_v37, %v2159_v10 }
 0x850   :  { %v911_v39 = vadd.f32 1e-12, %v909_v38 }
 0x852   :  { %2024 = vrsqrt.f32 %v911_v39  ;;  %vm919_vm4 = vweird.f32 %v911_v39 }
 0x856   :  { %v908_v40 = vpop.xlane.xlu0 %907 }
 0x857   :  { %v910_v41 = vmul.f32 %v908_v40, %v2159_v10 }
 0x858   :  { %v2025_v42 = vpop.eup %2024 }
 0x859   :  { %v914_v43 = vmul.f32 %v2025_v42, %v911_v39  ;;  %v912_v44 = vadd.f32 1e-12, %v910_v41  ;;  %vm920_vm3 = vweird.f32 %v2025_v42 }
 0x85a   :  { %vm921_vm5 = vmor %vm919_vm4, %vm920_vm3 }
 0x85b   :  { %v915_v45 = vmul.f32 %v2025_v42, %v914_v43  ;;  %2026 = vrsqrt.f32 %v912_v44  ;;  %vm929_vm7 = vweird.f32 %v912_v44 }
 0x85d   :  { %v916_v46 = vmul.f32 0.5, %v915_v45 }
 0x85f   :  { %v917_v47 = vsub.f32 1.5, %v916_v46 }
 0x861   :  { %v2027_v59 = vpop.eup %2026  ;;  %v918_v49 = vmul.f32 %v2025_v42, %v917_v47 }
 0x862   :  { %v924_v52 = vmul.f32 %v2027_v59, %v912_v44  ;;  %vm930_vm6 = vweird.f32 %v2027_v59 }
 0x863   :  { %v922_v48 = vsel %vm921_vm5, %v2025_v42, %v918_v49  ;;  %vm931_vm11 = vmor %vm929_vm7, %vm930_vm6  ;;  %vm1787_vm6 = vcmask 1041409   ;;  %vm1811_vm7 = vcmask 9216  }
 0x864   :  { %v933_v53 = vmul.f32 %v922_v48, %v899_v15  ;;  %v925_v54 = vmul.f32 %v2027_v59, %v924_v52 }
 0x866   :  { %v936_v58 = vmul.f32 %v935_v51, %v933_v53  ;;  %v926_v60 = vmul.f32 0.5, %v925_v54 }
 0x868   :  { %v927_v62 = vsub.f32 1.5, %v926_v60  ;;  %v2444_v63 = vadd.f32 %v938_v57, %v936_v58 }
 0x86a   :  { %v928_v0 = vmul.f32 %v2027_v59, %v927_v62  ;;  %1878 = vmatmul.msk.f32.vlgmr.msra.gmra.mxu1 %vm31_vm0, %v2444_v63 }
 0x86c   :  { %v932_v1 = vsel %vm931_vm11, %v2027_v59, %v928_v0 }
 0x86d   :  { %v934_v2 = vmul.f32 %v932_v1, %v900_v29 }
 0x86f   :  { %v937_v3 = vmul.f32 %v935_v51, %v934_v2 }
 0x871   :  { %v2448_v61 = vadd.f32 %v938_v57, %v937_v3 }
 0x873   :  { %1879 = vmatmul.msk.f32.gmra.mxu1 %vm31_vm0, %v2448_v61 }
 0x8e7   :  { %v985_v4 = vpop.f32.mrf.mxu1 }
 0x8e8   :  { %v2458_v6 = vadd.f32 %v985_v4, %v961_v50 }
 0x8ea   :  { %992 = vrot.lane.b32.xlu1 %v2458_v6, %s2100_s12 }
 0x8f0   :  { %v988_v7 = vpop.f32.mrf.mxu1 }
 0x8f1   :  { %v2462_v55 = vadd.f32 %v988_v7, %v961_v50 }
 0x8f2   :  { %1125 = vrot.lane.b32.xlu1 %v2458_v6, %s2102_s14 }
 0x8f3   :  { %1153 = vrot.lane.b32.xlu0 %v2462_v55, %s2102_s14  ;;  %1019 = vrot.lane.b32.xlu2 %v2462_v55, %s2100_s12  ;;  %v1948_v3 = vpack.i.bf16 %v2462_v55, %v2458_v6 }
 0x8fa   :  { %1285 = vrot.lane.b32.xlu1 %v2462_v55, %s2104_s16 }
 0x8fb   :  { %1151 = vrot.lane.b32.xlu0 %v2462_v55, %s2101_s13  ;;  %1123 = vrot.lane.b32.xlu2 %v2458_v6, %s2101_s13 }
 0x902   :  { %1421 = vrot.lane.b32.xlu1 %v2462_v55, %s2105_s17 }
 0x903   :  { %1287 = vrot.lane.b32.xlu0 %v2462_v55, %s2106_s18  ;;  %1259 = vrot.lane.b32.xlu2 %v2458_v6, %s2106_s18 }
 0x90a   :  { %1391 = vrot.lane.b32.xlu1 %v2458_v6, %s2103_s15 }
 0x90b   :  { %1257 = vrot.lane.b32.xlu0 %v2458_v6, %s2104_s16  ;;  %1419 = vrot.lane.b32.xlu2 %v2462_v55, %s2103_s15  ;;  %s2115_s16 = smov [#allocation2]  }
 0x913   :  { %1393 = vrot.lane.b32.xlu0 %v2458_v6, %s2105_s17  ;;  %s1818_s17 = sshll.u32 %s2115_s16, 4  ;;  %s1819_s17 = int_to_ptr.vmem [resolvable:$true] %s1818_s17 }
 0x94d   :  { %v1020_v8 = vpop.permute.xlu2 %1019 }
 0x94e   :  { %1882 = vmatpush.xpose.msk.msra.mxu0 %vm144_vm8, %v1020_v8 }
 0x951   :  { %1883 = vmatmul.msk.f32.vlgmr.msra.gmra.mxu0 %vm144_vm8, %v2462_v55 }
 0x955   :  { %v1124_v9 = vpop.permute.xlu2 %1123 }
 0x95c   :  { %v993_v11 = vpop.permute.xlu1 %992 }
 0x95d   :  { %1880 = vmatpush.xpose.msk.msra.mxu2 %vm144_vm8, %v993_v11  ;;  %v1260_v22 = vpop.permute.xlu2 %1259 }
 0x960   :  { %1881 = vmatmul.msk.f32.vlgmr.msra.gmra.mxu2 %vm144_vm8, %v2458_v6 }
 0x964   :  { %v1126_v21 = vpop.permute.xlu1 %1125 }
 0x965   :  { %v1154_v23 = vpop.permute.xlu0 %1153  ;;  %1886 = vmatpush.xpose.msk.msrb.mxu0 %vm144_vm8, %v1126_v21  ;;  %v1420_v13 = vpop.permute.xlu2 %1419 }
 0x966   :  { %1888 = vmatpush.xpose.msk.msra.mxu3 %vm144_vm8, %v1154_v23 }
 0x968   :  { %1887 = vmatmul.msk.f32.vlgmr.msrb.gmra.mxu0 %vm144_vm8, %v1124_v9 }
 0x969   :  { %1892 = vmatpush.xpose.msk.msra.mxu0 %vm144_vm8, %v1260_v22 }
 0x96c   :  { %v1286_v24 = vpop.permute.xlu1 %1285 }
 0x96d   :  { %v1152_v25 = vpop.permute.xlu0 %1151 }
 0x96e   :  { %1889 = vmatmul.msk.f32.vlgmr.msra.gmra.mxu3 %vm144_vm8, %v1152_v25 }
 0x974   :  { %v1422_v5 = vpop.permute.xlu1 %1421 }
 0x975   :  { %v1288_v26 = vpop.permute.xlu0 %1287 }
 0x976   :  { %1894 = vmatpush.xpose.msk.msrb.mxu3 %vm144_vm8, %v1288_v26 }
 0x979   :  { %1895 = vmatmul.msk.f32.vlgmr.msrb.gmra.mxu3 %vm144_vm8, %v1286_v24 }
 0x97a   :  { %1900 = vmatpush.xpose.msk.msra.mxu3 %vm144_vm8, %v1422_v5 }
 0x97c   :  { %v1392_v15 = vpop.permute.xlu1 %1391 }
 0x97d   :  { %v1258_v12 = vpop.permute.xlu0 %1257 }
 0x97e   :  { %1893 = vmatmul.msk.f32.vlgmr.msra.gmra.mxu0 %vm144_vm8, %v1258_v12 }
 0x981   :  { %1901 = vmatmul.msk.f32.vlgmr.msra.gmra.mxu3 %vm144_vm8, %v1420_v13 }
 0x985   :  { %v1394_v14 = vpop.permute.xlu0 %1393 }
 0x986   :  { %1898 = vmatpush.xpose.msk.msrb.mxu0 %vm144_vm8, %v1394_v14 }
 0x989   :  { %1899 = vmatmul.msk.f32.vlgmr.msrb.gmra.mxu0 %vm144_vm8, %v1392_v15 }
 0x9ce   :  { %v1042_v17 = vpop.f32.mrf.mxu0 }
 0x9cf   :  { %v1046_v18 = vmul.f32 0.35355338, %v1042_v17 }
 0x9d1   :  { %v1048_v20 = vadd.f32 %v1046_v18, %v2269_v28 }
 0x9d3   :  { %v1052_v27 = vsel %vm144_vm8, %v1048_v20, -inf }
 0x9d4   :  { %1053 = vmax.xlane.f32.xlu0 %v1052_v27 }
 0x9e3   :  { %v1015_v29 = vpop.f32.mrf.mxu2 }
 0x9e4   :  { %v1045_v19 = vmul.f32 0.35355338, %v1015_v29 }
 0x9e5   :  { %v1148_v30 = vpop.f32.mrf.mxu0 }
 0x9e6   :  { %v1179_v37 = vmul.f32 0.35355338, %v1148_v30  ;;  %v1047_v38 = vadd.f32 %v1045_v19, %v2265_v16 }
 0x9e8   :  { %v1049_v39 = vsel %vm144_vm8, %v1047_v38, -inf  ;;  %v1181_v40 = vadd.f32 %v1179_v37, %v2265_v16 }
 0x9e9   :  { %1050 = vmax.xlane.f32.xlu2 %v1049_v39 }
 0x9ea   :  { %v1183_v41 = vsel %vm144_vm8, %v1181_v40, -inf }
 0x9eb   :  { %1184 = vmax.xlane.f32.xlu1 %v1183_v41 }
 0x9f1   :  { %v1176_v42 = vpop.f32.mrf.mxu3 }
 0x9f2   :  { %v1180_v43 = vmul.f32 0.35355338, %v1176_v42 }
 0x9f4   :  { %v1182_v44 = vadd.f32 %v1180_v43, %v2269_v28 }
 0x9f6   :  { %v1186_v45 = vsel %vm144_vm8, %v1182_v44, -inf }
 0x9f7   :  { %1187 = vmax.xlane.f32.xlu2 %v1186_v45 }
 0x9fb   :  { %v1282_v46 = vpop.f32.mrf.mxu0 }
 0x9fc   :  { %v1313_v47 = vmul.f32 0.35355338, %v1282_v46  ;;  %v1310_v59 = vpop.f32.mrf.mxu3 }
 0x9fd   :  { %v1314_v49 = vmul.f32 0.35355338, %v1310_v59 }
 0x9fe   :  { %v1315_v51 = vadd.f32 %v1313_v47, %v2265_v16 }
 0x9ff   :  { %v1316_v52 = vadd.f32 %v1314_v49, %v2269_v28 }
 0xa00   :  { %v1317_v48 = vsel %vm144_vm8, %v1315_v51, -inf }
 0xa01   :  { %1318 = vmax.xlane.f32.xlu0 %v1317_v48  ;;  %v1320_v53 = vsel %vm144_vm8, %v1316_v52, -inf }
 0xa02   :  { %1321 = vmax.xlane.f32.xlu2 %v1320_v53 }
 0xa04   :  { %v1444_v54 = vpop.f32.mrf.mxu3 }
 0xa05   :  { %v1448_v57 = vmul.f32 0.35355338, %v1444_v54 }
 0xa06   :  { %v1416_v58 = vpop.f32.mrf.mxu0 }
 0xa07   :  { %v1447_v60 = vmul.f32 0.35355338, %v1416_v58  ;;  %v2521_v62 = vadd.f32 %v1448_v57, %v2269_v28 }
 0xa09   :  { %v1454_v0 = vsel %vm144_vm8, %v2521_v62, -inf  ;;  %v1449_v1 = vadd.f32 %v1447_v60, %v2265_v16 }
 0xa0a   :  { %1455 = vmax.xlane.f32.xlu0 %v1454_v0 }
 0xa0b   :  { %v1451_v2 = vsel %vm144_vm8, %v1449_v1, -inf }
 0xa0c   :  { %1452 = vmax.xlane.f32.xlu1 %v1451_v2 }
 0xa1a   :  { %1949 = vrot.lane.b32.xlu2 %v1948_v3, %s2108_s21 }
 0xa47   :  { %v1054_v50 = vpop.xlane.xlu0 %1053 }
 0xa48   :  { %v1056_v4 = vsub.f32 %v1048_v20, %v1054_v50 }
 0xa4a   :  { %v1059_v7 = vmul.f32 1.442695, %v1056_v4 }
 0xa4c   :  { %2028 = vpow2.f32 %v1059_v7 }
 0xa52   :  { %v2530_v28 = vpop.eup %2028 }
 0xa53   :  { %v1064_v8 = vsel %vm144_vm8, %v2530_v28, 0.0 }
 0xa54   :  { %1065 = vadd.xlane.f32.xlu1 %v1064_v8 }
 0xa5c   :  { %v1051_v16 = vpop.xlane.xlu2 %1050 }
 0xa5d   :  { %v1055_v9 = vsub.f32 %v1047_v38, %v1051_v16 }
 0xa5e   :  { %v1185_v11 = vpop.xlane.xlu1 %1184 }
 0xa5f   :  { %v1057_v21 = vmul.f32 1.442695, %v1055_v9  ;;  %v1189_v22 = vsub.f32 %v1181_v40, %v1185_v11 }
 0xa61   :  { %2030 = vpow2.f32 %v1057_v21  ;;  %v1191_v23 = vmul.f32 1.442695, %v1189_v22 }
 0xa63   :  { %2032 = vpow2.f32 %v1191_v23 }
 0xa67   :  { %v2031_v6 = vpop.eup %2030 }
 0xa68   :  { %v1061_v55 = vsel %vm144_vm8, %v2031_v6, 0.0 }
 0xa69   :  { %v2535_v24 = vpop.eup %2032  ;;  %1062 = vadd.xlane.f32.xlu2 %v1061_v55 }
 0xa6a   :  { %v1188_v25 = vpop.xlane.xlu2 %1187  ;;  %v1195_v26 = vsel %vm144_vm8, %v2535_v24, 0.0 }
 0xa6b   :  { %v1190_v5 = vsub.f32 %v1182_v44, %v1188_v25  ;;  %1196 = vadd.xlane.f32.xlu0 %v1195_v26 }
 0xa6d   :  { %v1193_v12 = vmul.f32 1.442695, %v1190_v5 }
 0xa6f   :  { %2034 = vpow2.f32 %v1193_v12 }
 0xa74   :  { %v1319_v14 = vpop.xlane.xlu0 %1318 }
 0xa75   :  { %v2539_v13 = vpop.eup %2034  ;;  %v1322_v15 = vpop.xlane.xlu2 %1321  ;;  %v1323_v20 = vsub.f32 %v1315_v51, %v1319_v14 }
 0xa76   :  { %v1324_v17 = vsub.f32 %v1316_v52, %v1322_v15  ;;  %v1198_v18 = vsel %vm144_vm8, %v2539_v13, 0.0 }
 0xa77   :  { %1199 = vadd.xlane.f32.xlu1 %v1198_v18  ;;  %v1325_v29 = vmul.f32 1.442695, %v1323_v20 }
 0xa78   :  { %v1327_v27 = vmul.f32 1.442695, %v1324_v17 }
 0xa7a   :  { %2036 = vpow2.f32 %v1327_v27 }
 0xa7b   :  { %2038 = vpow2.f32 %v1325_v29 }
 0xa7d   :  { %v1950_v19 = vpop.permute.xlu2 %1949  ;;  %v1456_v43 = vpop.xlane.xlu0 %1455 }
 0xa7e   :  { %v1952_v30 = vunpack.i.h.bf16 %v1950_v19  ;;  %v1951_v37 = vunpack.i.l.bf16 %v1950_v19  ;;  %v1458_v45 = vsub.f32 %v2521_v62, %v1456_v43 }
 0xa7f   :  { %v1453_v38 = vpop.xlane.xlu1 %1452 }
 0xa80   :  { %v2543_v39 = vpop.eup %2036  ;;  %v1457_v40 = vsub.f32 %v1449_v1, %v1453_v38  ;;  %1092 = vmatpush.msrb.mxu1 %v1951_v37  ;;  %1118 = vmatpush.msrb.mxu2 %v1952_v30  ;;  %v1461_v47 = vmul.f32 1.442695, %v1458_v45 }
 0xa81   :  { %1959 = vrot.lane.b32.xlu2 %v1948_v3, %s2109_s22  ;;  %v1332_v41 = vsel %vm144_vm8, %v2543_v39, 0.0  ;;  %v2039_v44 = vpop.eup %2038 }
 0xa82   :  { %1333 = vadd.xlane.f32.xlu0 %v1332_v41  ;;  %v1459_v42 = vmul.f32 1.442695, %v1457_v40  ;;  %v1329_v46 = vsel %vm144_vm8, %v2039_v44, 0.0 }
 0xa84   :  { %2040 = vpow2.f32 %v1459_v42 }
 0xa85   :  { %2042 = vpow2.f32 %v1461_v47 }
 0xa89   :  { %1964 = vrot.lane.b32.xlu2 %v1948_v3, %s2110_s23 }
 0xa8a   :  { %1330 = vadd.xlane.f32.xlu0 %v1329_v46  ;;  %v2041_v59 = vpop.eup %2040 }
 0xa8b   :  { %v1463_v49 = vsel %vm144_vm8, %v2041_v59, 0.0  ;;  %v2043_v51 = vpop.eup %2042 }
 0xa8c   :  { %v1466_v52 = vsel %vm144_vm8, %v2043_v51, 0.0 }
 0xa90   :  { %1954 = vrot.lane.b32.xlu1 %v1948_v3, %s2107_s1  ;;  %s1820_s1 = sshll.u32 %s2678_s6, 4  ;;  %s1821_s1 = int_to_ptr.hbm [resolvable:$true] %s1820_s1 }
 0xa91   :  { %1974 = vrot.lane.b32.xlu2 %v1973_v36, %s2111_s24 }
 0xa92   :  { %1464 = vadd.xlane.f32.xlu0 %v1463_v49 }
 0xa98   :  { %1969 = vrot.lane.b32.xlu1 %v1968_v35, %s2111_s24 }
 0xa9a   :  { %1467 = vadd.xlane.f32.xlu0 %v1466_v52  ;;  %v1555_v52 = vperm.slane %v2455_v56, 1 }
 0xac7   :  { %v1066_v48 = vpop.xlane.xlu1 %1065 }
 0xac8   :  { %2044 = vrcp.f32 %v1066_v48 }
 0xace   :  { %v2045_v53 = vpop.eup %2044 }
 0xacf   :  { %v1070_v54 = vmul.f32 %v2045_v53, %v2530_v28 }
 0xad1   :  { %1885 = vmatmul.msk.f32.vlgmr.msrb.gmra.mxu2 %vm144_vm8, %v1070_v54 }
 0xadc   :  { %v1063_v57 = vpop.xlane.xlu2 %1062 }
 0xadd   :  { %2046 = vrcp.f32 %v1063_v57 }
 0xade   :  { %v1197_v36 = vpop.xlane.xlu0 %1196 }
 0xadf   :  { %2048 = vrcp.f32 %v1197_v36 }
 0xae3   :  { %v2047_v31 = vpop.eup %2046 }
 0xae4   :  { %v1069_v34 = vmul.f32 %v2047_v31, %v2031_v6  ;;  %v1960_v33 = vpop.permute.xlu2 %1959 }
 0xae5   :  { %v2049_v60 = vpop.eup %2048  ;;  %v1962_v7 = vunpack.i.h.bf16 %v1960_v33  ;;  %v1961_v28 = vunpack.i.l.bf16 %v1960_v33 }
 0xae6   :  { %1884 = vmatmul.msk.f32.vlgmr.msrb.gmra.mxu1 %vm144_vm8, %v1069_v34  ;;  %v1203_v50 = vmul.f32 %v2049_v60, %v2535_v24 }
 0xaea   :  { %v1200_v32 = vpop.xlane.xlu1 %1199 }
 0xaeb   :  { %2050 = vrcp.f32 %v1200_v32 }
 0xaec   :  { %v1965_v1 = vpop.permute.xlu2 %1964 }
 0xaed   :  { %v1967_v16 = vunpack.i.h.bf16 %v1965_v1  ;;  %v1966_v9 = vunpack.i.l.bf16 %v1965_v1 }
 0xaf1   :  { %v2051_v62 = vpop.eup %2050 }
 0xaf2   :  { %v1204_v4 = vmul.f32 %v2051_v62, %v2539_v13 }
 0xaf4   :  { %v1975_v30 = vpop.permute.xlu2 %1974 }
 0xaf5   :  { %v1334_v58 = vpop.xlane.xlu0 %1333  ;;  %v1976_v37 = vunpack.i.l.bf16 %v1975_v30  ;;  %v1977_v38 = vunpack.i.h.bf16 %v1975_v30 }
 0xaf6   :  { %2052 = vrcp.f32 %v1334_v58 }
 0xafc   :  { %v2053_v11 = vpop.eup %2052 }
 0xafd   :  { %v1331_v35 = vpop.xlane.xlu0 %1330  ;;  %v1338_v22 = vmul.f32 %v2053_v11, %v2543_v39 }
 0xafe   :  { %2054 = vrcp.f32 %v1331_v35 }
 0xb02   :  { %v1955_v0 = vpop.permute.xlu1 %1954 }
 0xb03   :  { %v1957_v2 = vunpack.i.h.bf16 %v1955_v0  ;;  %v1956_v3 = vunpack.i.l.bf16 %v1955_v0 }
 0xb04   :  { %v2055_v21 = vpop.eup %2054 }
 0xb05   :  { %v1465_v8 = vpop.xlane.xlu0 %1464  ;;  %1226 = vmatpush.msra.mxu1 %v1956_v3  ;;  %1252 = vmatpush.msra.mxu2 %v1957_v2  ;;  %v1337_v23 = vmul.f32 %v2055_v21, %v2039_v44 }
 0xb06   :  { %1890 = vmatmul.msk.f32.vlgmr.msra.gmra.mxu1 %vm144_vm8, %v1203_v50  ;;  %1891 = vmatmul.msk.f32.vlgmr.msra.gmra.mxu2 %vm144_vm8, %v1204_v4  ;;  %2056 = vrcp.f32 %v1465_v8  ;;  %v1866_v50 = vld [vmem:[%s2675_s3 + $0x68] sm:$0xff]  ;;  %v1864_v4 = vld [vmem:[%s2675_s3 + $0x58] sm:$0xff] }
 0xb07   :  { %1360 = vmatpush.msrb.mxu1 %v1961_v28  ;;  %1386 = vmatpush.msrb.mxu2 %v1962_v7  ;;  %v1862_v7 = vld [vmem:[%s2675_s3 + $0x48] sm:$0xff] }
 0xb09   :  { %1494 = vmatpush.msra.mxu1 %v1966_v9  ;;  %1520 = vmatpush.msra.mxu2 %v1967_v16 }
 0xb0a   :  { %v1970_v27 = vpop.permute.xlu1 %1969 }
 0xb0b   :  { %v1972_v29 = vunpack.i.h.bf16 %v1970_v27  ;;  %v1971_v19 = vunpack.i.l.bf16 %v1970_v27 }
 0xb0c   :  { %v2057_v55 = vpop.eup %2056 }
 0xb0d   :  { %v1468_v6 = vpop.xlane.xlu0 %1467  ;;  %v1471_v25 = vmul.f32 %v2057_v55, %v2041_v59  ;;  %1590 = vmatpush.msra.mxu0 %v1971_v19 }
 0xb0e   :  { %2058 = vrcp.f32 %v1468_v6  ;;  %1896 = vmatmul.msk.f32.vlgmr.msrb.gmra.mxu1 %vm144_vm8, %v1337_v23  ;;  %1897 = vmatmul.msk.f32.vlgmr.msrb.gmra.mxu2 %vm144_vm8, %v1338_v22 }
 0xb0f   :  { %1591 = vmatpush.msra.mxu0 %v1972_v29 }
 0xb11   :  { %1592 = vmatpush.msra.mxu0 %v1976_v37 }
 0xb13   :  { %1593 = vmatpush.msra.mxu0 %v1977_v38 }
 0xb14   :  { %v2059_v24 = vpop.eup %2058 }
 0xb15   :  { %v1472_v26 = vmul.f32 %v2059_v24, %v2043_v51 }
 0xb16   :  { %1902 = vmatmul.msk.f32.vlgmr.msra.gmra.mxu1 %vm144_vm8, %v1471_v25 }
 0xb17   :  { %1903 = vmatmul.msk.f32.vlgmr.msra.gmra.mxu2 %vm144_vm8, %v1472_v26  ;;  %v1647_v26 = vperm.slane %v2455_v56, 2 }
 0xb54   :  { %v1120_v12 = vpop.f32.mrf.mxu2 }
 0xb63   :  { %v1094_v5 = vpop.f32.mrf.mxu1 }
 0xb83   :  { %v1228_v13 = vpop.f32.mrf.mxu1 }
 0xb84   :  { %1527 = vrot.lane.b32.xlu0 %v1228_v13, %s2112_s0  ;;  %v1650_v13 = vperm.slane %v2455_v56, 3 }
 0xb89   :  { %v1254_v14 = vpop.f32.mrf.mxu2 }
 0xb8b   :  { %v1362_v15 = vpop.f32.mrf.mxu1 }
 0xb8c   :  { %1535 = vrot.lane.b32.xlu1 %v1362_v15, %s2113_s25 }
 0xb91   :  { %v1388_v17 = vpop.f32.mrf.mxu2 }
 0xb93   :  { %v1496_v18 = vpop.f32.mrf.mxu1 }
 0xb94   :  { %1529 = vrot.lane.b32.xlu1 %v1254_v14, %s2112_s0  ;;  %1543 = vrot.lane.b32.xlu2 %v1496_v18, %s2114_s26 }
 0xb9a   :  { %v1522_v20 = vpop.f32.mrf.mxu2 }
 0xb9c   :  { %1545 = vrot.lane.b32.xlu1 %v1522_v20, %s2114_s26  ;;  %1537 = vrot.lane.b32.xlu2 %v1388_v17, %s2113_s25 }
 0xbee   :  { %v1544_v42 = vpop.permute.xlu2 %1543 }
 0xbf6   :  { %v1528_v39 = vpop.permute.xlu0 %1527  ;;  %v1538_v47 = vpop.permute.xlu2 %1537 }
 0xbf7   :  { %v1549_v40 = vsel %vm144_vm8, %v1094_v5, %v1528_v39 }
 0xbfe   :  { %v1536_v41 = vpop.permute.xlu1 %1535 }
 0xbff   :  { %v1551_v43 = vsel %vm706_vm9, %v1549_v40, %v1536_v41  ;;  %v1876_v40 = vld [vmem:[%s2676_s4 + $0x78] sm:$0xff]  ;;  %v1875_v41 = vld [vmem:[%s2676_s4 + $0x70] sm:$0xff] }
 0xc00   :  { %v1553_v44 = vsel %vm709_vm10, %v1551_v43, %v1544_v42  ;;  %1716 = vmatpush.msrb.mxu1 %v1876_v40  ;;  %v1874_v42 = vld [vmem:[%s2676_s4 + $0x68] sm:$0xff]  ;;  %v1873_v43 = vld [vmem:[%s2676_s4 + $0x60] sm:$0xff] }
 0xc01   :  { %1904 = vmatmul.msk.f32.vlgmr.msra.gmra.mxu0 %vm31_vm0, %v1553_v44  ;;  %v1872_v44 = vld [vmem:[%s2676_s4 + $0x58] sm:$0xff] }
 0xc02   :  { %1717 = vmatpush.msrb.mxu1 %v1875_v41 }
 0xc04   :  { %1718 = vmatpush.msrb.mxu1 %v1874_v42 }
 0xc06   :  { %v1530_v45 = vpop.permute.xlu1 %1529  ;;  %1719 = vmatpush.msrb.mxu1 %v1873_v43 }
 0xc07   :  { %v1550_v46 = vsel %vm144_vm8, %v1120_v12, %v1530_v45  ;;  %v1871_v45 = vld [vmem:[%s2676_s4 + $0x50] sm:$0xff] }
 0xc08   :  { %v1552_v49 = vsel %vm706_vm9, %v1550_v46, %v1538_v47  ;;  %1720 = vmatpush.msrb.mxu1 %v1872_v44  ;;  %v1870_v46 = vld [vmem:[%s2676_s4 + $0x48] sm:$0xff]  ;;  %v1869_v47 = vld [vmem:[%s2676_s4 + $0x40] sm:$0xff] }
 0xc0a   :  { %1721 = vmatpush.msrb.mxu1 %v1871_v45 }
 0xc0c   :  { %1722 = vmatpush.msrb.mxu1 %v1870_v46 }
 0xc0e   :  { %v1546_v59 = vpop.permute.xlu1 %1545  ;;  %1723 = vmatpush.msrb.mxu1 %v1869_v47 }
 0xc0f   :  { %v1554_v51 = vsel %vm709_vm10, %v1552_v49, %v1546_v59  ;;  %v1653_v59 = vperm.slane %v2455_v56, 4 }
 0xc10   :  { %1905 = vmatmul.msk.f32.gmra.mxu0 %vm31_vm0, %v1554_v51 }
 0xc7e   :  { %v1595_v48 = vpop.f32.mrf.mxu0 }
 0xc7f   :  { %v1596_v53 = vadd.f32 %v1595_v48, %v1555_v52 }
 0xc81   :  { %v1601_v54 = vadd.f32 %v1596_v53, %v2444_v63 }
 0xc83   :  { %v1603_v57 = vsel %vm31_vm0, %v1601_v54, 0.0 }
 0xc84   :  { %1604 = vadd.xlane.f32.xlu0 %v1603_v57 }
 0xc8d   :  { %v1598_v31 = vpop.f32.mrf.mxu0 }
 0xc8e   :  { %v1599_v34 = vadd.f32 %v1598_v31, %v1555_v52 }
 0xc90   :  { %v1602_v36 = vadd.f32 %v1599_v34, %v2448_v61  ;;  %v1868_v61 = vld [vmem:[%s2675_s3 + $0x78] sm:$0xff] }
 0xc91   :  { %1672 = vmatpush.msrb.mxu3 %v1868_v61 }
 0xc92   :  { %v1606_v58 = vsel %vm31_vm0, %v1602_v36, 0.0 }
 0xc93   :  { %1607 = vadd.xlane.f32.xlu2 %v1606_v58  ;;  %1673 = vmatpush.msrb.mxu3 %v1866_v50  ;;  %v1701_v50 = vperm.slane %v2455_v56, 5 }
 0xc95   :  { %1674 = vmatpush.msrb.mxu3 %v1864_v4 }
 0xc97   :  { %1675 = vmatpush.msrb.mxu3 %v1862_v7 }
 0xcf7   :  { %v1605_v32 = vpop.xlane.xlu0 %1604 }
 0xcf8   :  { %v1609_v33 = vmul.f32 %v1605_v32, %v2159_v10 }
 0xcfa   :  { %v1611_v35 = vsub.f32 %v1601_v54, %v1609_v33 }
 0xcfc   :  { %v1613_v60 = vmul.f32 %v1611_v35, %v1611_v35 }
 0xcfe   :  { %v1615_v62 = vsel %vm31_vm0, %v1613_v60, 0.0 }
 0xcff   :  { %1616 = vadd.xlane.f32.xlu1 %v1615_v62 }
 0xd06   :  { %v1608_v0 = vpop.xlane.xlu2 %1607 }
 0xd07   :  { %v1610_v63 = vmul.f32 %v1608_v0, %v2159_v10 }
 0xd09   :  { %v1612_v1 = vsub.f32 %v1602_v36, %v1610_v63 }
 0xd0b   :  { %v1614_v2 = vmul.f32 %v1612_v1, %v1612_v1 }
 0xd0d   :  { %v1618_v3 = vsel %vm31_vm0, %v1614_v2, 0.0 }
 0xd0e   :  { %1619 = vadd.xlane.f32.xlu0 %v1618_v3 }
 0xd72   :  { %v1617_v28 = vpop.xlane.xlu1 %1616 }
 0xd73   :  { %v1621_v8 = vmul.f32 %v1617_v28, %v2159_v10 }
 0xd75   :  { %v1623_v16 = vadd.f32 1e-12, %v1621_v8 }
 0xd77   :  { %2060 = vrsqrt.f32 %v1623_v16  ;;  %vm1631_vm9 = vweird.f32 %v1623_v16 }
 0xd7d   :  { %v2061_v9 = vpop.eup %2060 }
 0xd7e   :  { %v1626_v11 = vmul.f32 %v2061_v9, %v1623_v16  ;;  %vm1632_vm8 = vweird.f32 %v2061_v9 }
 0xd7f   :  { %vm1633_vm10 = vmor %vm1631_vm9, %vm1632_vm8 }
 0xd80   :  { %v1627_v21 = vmul.f32 %v2061_v9, %v1626_v11 }
 0xd81   :  { %v1620_v22 = vpop.xlane.xlu0 %1619 }
 0xd82   :  { %v1628_v23 = vmul.f32 0.5, %v1627_v21  ;;  %v1622_v6 = vmul.f32 %v1620_v22, %v2159_v10 }
 0xd84   :  { %v1629_v55 = vsub.f32 1.5, %v1628_v23  ;;  %v1624_v24 = vadd.f32 1e-12, %v1622_v6 }
 0xd86   :  { %v1630_v25 = vmul.f32 %v2061_v9, %v1629_v55  ;;  %2062 = vrsqrt.f32 %v1624_v24  ;;  %vm1641_vm13 = vweird.f32 %v1624_v24 }
 0xd88   :  { %v1634_v5 = vsel %vm1633_vm10, %v2061_v9, %v1630_v25 }
 0xd89   :  { %v1645_v12 = vmul.f32 %v1634_v5, %v1611_v35 }
 0xd8b   :  { %v1648_v14 = vmul.f32 %v1647_v26, %v1645_v12 }
 0xd8c   :  { %v2063_v15 = vpop.eup %2062 }
 0xd8d   :  { %v1636_v17 = vmul.f32 %v2063_v15, %v1624_v24  ;;  %v1651_v18 = vadd.f32 %v1650_v13, %v1648_v14  ;;  %vm1642_vm12 = vweird.f32 %v2063_v15 }
 0xd8e   :  { %vm1643_vm14 = vmor %vm1641_vm13, %vm1642_vm12 }
 0xd8f   :  { %v1637_v20 = vmul.f32 %v2063_v15, %v1636_v17  ;;  %1906 = vmatmul.msk.f32.vlgmr.msrb.gmra.mxu3 %vm31_vm0, %v1651_v18 }
 0xd91   :  { %v1638_v27 = vmul.f32 0.5, %v1637_v20  ;;  %v27_v20 = vld [vmem:[%s2674_s2 + $0x18] sm:$0xff] }
 0xd93   :  { %v1639_v29 = vsub.f32 1.5, %v1638_v27  ;;  %v26_v27 = vld [vmem:[%s2674_s2 + $0x10] sm:$0xff] }
 0xd95   :  { %v1640_v19 = vmul.f32 %v2063_v15, %v1639_v29 }
 0xd97   :  { %v1644_v30 = vsel %vm1643_vm14, %v2063_v15, %v1640_v19  ;;  %v25_v19 = vld [vmem:[%s2674_s2 + $0x8] sm:$0xff] }
 0xd98   :  { %v1646_v37 = vmul.f32 %v1644_v30, %v1612_v1 }
 0xd9a   :  { %v1649_v38 = vmul.f32 %v1647_v26, %v1646_v37 }
 0xd9c   :  { %v1652_v39 = vadd.f32 %v1650_v13, %v1649_v38 }
 0xd9e   :  { %1907 = vmatmul.msk.f32.gmra.mxu3 %vm31_vm0, %v1652_v39 }
 0xe12   :  { %v1677_v49 = vpop.f32.mrf.mxu3 }
 0xe13   :  { %v1678_v51 = vadd.f32 %v1677_v49, %v1653_v59 }
 0xe15   :  { %v1685_v52 = vmul.f32 0.044715, %v1678_v51  ;;  %v1683_v32 = vmul.f32 0.5, %v1678_v51 }
 0xe17   :  { %v1687_v48 = vmul.f32 %v1685_v52, %v1678_v51 }
 0xe19   :  { %v1689_v53 = vmul.f32 %v1687_v48, %v1678_v51 }
 0xe1b   :  { %v1691_v54 = vadd.f32 %v1689_v53, %v1678_v51 }
 0xe1d   :  { %v1693_v57 = vmul.f32 0.7978846, %v1691_v54 }
 0xe1f   :  { %2064 = vtanh.f32 %v1693_v57 }
 0xe21   :  { %v1680_v31 = vpop.f32.mrf.mxu3 }
 0xe22   :  { %v1681_v34 = vadd.f32 %v1680_v31, %v1653_v59  ;;  %v1780_v31 = vperm.slane %v2455_v56, 7 }
 0xe24   :  { %v1686_v36 = vmul.f32 0.044715, %v1681_v34  ;;  %v1684_v2 = vmul.f32 0.5, %v1681_v34 }
 0xe25   :  { %v2065_v58 = vpop.eup %2064 }
 0xe26   :  { %v1697_v33 = vadd.f32 1.0, %v2065_v58  ;;  %v1688_v35 = vmul.f32 %v1686_v36, %v1681_v34 }
 0xe28   :  { %v1699_v60 = vmul.f32 %v1697_v33, %v1683_v32  ;;  %v1690_v62 = vmul.f32 %v1688_v35, %v1681_v34  ;;  %v2072_v33 = vld [vmem:[%s2674_s2] sm:$0xff] }
 0xe29   :  { %v1783_v35 = vperm.slane %v2072_v33, 2 }
 0xe2a   :  { %1908 = vmatmul.msk.f32.vlgmr.msrb.gmra.mxu1 %vm859_vm2, %v1699_v60  ;;  %v1692_v0 = vadd.f32 %v1690_v62, %v1681_v34 }
 0xe2c   :  { %v1694_v63 = vmul.f32 0.7978846, %v1692_v0 }
 0xe2e   :  { %2066 = vtanh.f32 %v1694_v63 }
 0xe34   :  { %v2067_v1 = vpop.eup %2066 }
 0xe35   :  { %v1698_v3 = vadd.f32 1.0, %v2067_v1 }
 0xe37   :  { %v1700_v61 = vmul.f32 %v1698_v3, %v1684_v2 }
 0xe39   :  { %1909 = vmatmul.msk.f32.gmra.mxu1 %vm859_vm2, %v1700_v61 }
 0xea7   :  { %v1725_v4 = vpop.f32.mrf.mxu1 }
 0xea8   :  { %v1726_v7 = vadd.f32 %v1725_v4, %v1701_v50 }
 0xeaa   :  { %v1731_v28 = vadd.f32 %v1726_v7, %v1651_v18  ;;  %v28_v18 = vld [vmem:[%s2674_s2 + $0x20] sm:$0xff] }
 0xeab   :  { %1803 = vmatpush.msrb.mxu2 %v28_v18 }
 0xeac   :  { %v1733_v8 = vsel %vm31_vm0, %v1731_v28, 0.0 }
 0xead   :  { %1734 = vadd.xlane.f32.xlu1 %v1733_v8  ;;  %1804 = vmatpush.msrb.mxu2 %v27_v20 }
 0xeaf   :  { %1805 = vmatpush.msrb.mxu2 %v26_v27 }
 0xeb1   :  { %1806 = vmatpush.msrb.mxu2 %v25_v19 }
 0xeb6   :  { %v1728_v16 = vpop.f32.mrf.mxu1 }
 0xeb7   :  { %v1729_v9 = vadd.f32 %v1728_v16, %v1701_v50 }
 0xeb9   :  { %v1732_v11 = vadd.f32 %v1729_v9, %v1652_v39 }
 0xebb   :  { %v1736_v21 = vsel %vm31_vm0, %v1732_v11, 0.0 }
 0xebc   :  { %1737 = vadd.xlane.f32.xlu2 %v1736_v21 }
 0xf20   :  { %v1735_v22 = vpop.xlane.xlu1 %1734 }
 0xf21   :  { %v1739_v23 = vmul.f32 %v1735_v22, %v2159_v10 }
 0xf23   :  { %v1741_v6 = vsub.f32 %v1731_v28, %v1739_v23 }
 0xf25   :  { %v1743_v55 = vmul.f32 %v1741_v6, %v1741_v6 }
 0xf27   :  { %v1745_v24 = vsel %vm31_vm0, %v1743_v55, 0.0 }
 0xf28   :  { %1746 = vadd.xlane.f32.xlu2 %v1745_v24 }
 0xf2f   :  { %v1738_v25 = vpop.xlane.xlu2 %1737 }
 0xf30   :  { %v1740_v26 = vmul.f32 %v1738_v25, %v2159_v10 }
 0xf32   :  { %v1742_v5 = vsub.f32 %v1732_v11, %v1740_v26 }
 0xf34   :  { %v1744_v12 = vmul.f32 %v1742_v5, %v1742_v5 }
 0xf36   :  { %v1748_v13 = vsel %vm31_vm0, %v1744_v12, 0.0 }
 0xf37   :  { %1749 = vadd.xlane.f32.xlu0 %v1748_v13 }
 0xf9b   :  { %v1747_v14 = vpop.xlane.xlu2 %1746 }
 0xf9c   :  { %v1751_v15 = vmul.f32 %v1747_v14, %v2159_v10 }
 0xf9e   :  { %v1753_v17 = vadd.f32 1e-12, %v1751_v15 }
 0xfa0   :  { %2068 = vrsqrt.f32 %v1753_v17  ;;  %vm1761_vm1 = vweird.f32 %v1753_v17 }
 0xfa6   :  { %v2069_v29 = vpop.eup %2068 }
 0xfa7   :  { %v1756_v30 = vmul.f32 %v2069_v29, %v1753_v17  ;;  %vm1762_vm15 = vweird.f32 %v2069_v29 }
 0xfa8   :  { %vm1763_vm2 = vmor %vm1761_vm1, %vm1762_vm15 }
 0xfa9   :  { %v1757_v39 = vmul.f32 %v2069_v29, %v1756_v30 }
 0xfaa   :  { %v1750_v37 = vpop.xlane.xlu0 %1749 }
 0xfab   :  { %v1752_v38 = vmul.f32 %v1750_v37, %v2159_v10  ;;  %v1758_v41 = vmul.f32 0.5, %v1757_v39  ;;  %v1777_v10 = vperm.slane %v2455_v56, 6 }
 0xfad   :  { %v1754_v40 = vadd.f32 1e-12, %v1752_v38  ;;  %v1759_v42 = vsub.f32 1.5, %v1758_v41 }
 0xfaf   :  { %2070 = vrsqrt.f32 %v1754_v40  ;;  %v1760_v45 = vmul.f32 %v2069_v29, %v1759_v42  ;;  %vm1771_vm4 = vweird.f32 %v1754_v40 }
 0xfb1   :  { %v1764_v59 = vsel %vm1763_vm2, %v2069_v29, %v1760_v45 }
 0xfb2   :  { %v1775_v52 = vmul.f32 %v1764_v59, %v1741_v6 }
 0xfb4   :  { %v1778_v54 = vmul.f32 %v1777_v10, %v1775_v52 }
 0xfb5   :  { %v2071_v43 = vpop.eup %2070 }
 0xfb6   :  { %v1766_v44 = vmul.f32 %v2071_v43, %v1754_v40  ;;  %vm1772_vm3 = vweird.f32 %v2071_v43  ;;  %v1781_v36 = vadd.f32 %v1780_v31, %v1778_v54 }
 0xfb7   :  { %vm1773_vm5 = vmor %vm1771_vm4, %vm1772_vm3 }
 0xfb8   :  { %v1767_v46 = vmul.f32 %v2071_v43, %v1766_v44 }
 0xfba   :  { %v1768_v47 = vmul.f32 0.5, %v1767_v46 }
 0xfbc   :  { %v1769_v49 = vsub.f32 1.5, %v1768_v47 }
 0xfbe   :  { %v1770_v51 = vmul.f32 %v2071_v43, %v1769_v49 }
 0xfc0   :  { %v1774_v48 = vsel %vm1773_vm5, %v2071_v43, %v1770_v51 }
 0xfc1   :  { %v1776_v53 = vmul.f32 %v1774_v48, %v1742_v5 }
 0xfc3   :  { %v1779_v57 = vmul.f32 %v1777_v10, %v1776_v53 }
 0xfc5   :  { %v1782_v34 = vadd.f32 %v1780_v31, %v1779_v57 }
 0xfc7   :  { %v1786_v58 = vrot.slane %v1782_v34, 7 }
 0xfc9   :  { %v1788_v32 = vsel %vm1787_vm6, %v1786_v58, %v1781_v36 }
 0xfca   :  { %1910 = vmatmul.msk.f32.vlgmr.msrb.gmra.mxu2 %vm31_vm0, %v1788_v32 }
0x104d   :  { %v1808_v60 = vpop.f32.mrf.mxu2 }
0x104e   :  { %v1809_v56 = vadd.f32 %v1808_v60, %v1783_v35 }
0x1050   :  { %1812 = vst.msk [vmem:[#allocation2] sm:$0x3] %vm1811_vm7, %v1809_v56 }
0x1051   :  { %1823 = dma.vmem_to_hbm [thread:$0]  %s1819_s17, 32, %s1821_s1, [#allocation3]  }
0x1052   :  { %2097 = dma.done.wait [#allocation3], 32  }
0x1053   :  { %2098 = vsyncadd [#allocation3], 4294967264 }
0x1054   :  { %1828 = vsyncpa [#allocation3], 1 }

</bundles_post_ra>
